<compile_context>
chip_gen: v7x
topology: tpu7x:2x2x1
jax: 0.10.0
libtpu: 0.0.40
codegen_flags: <defaults>
</compile_context>

<pallas_src>
import functools
import math

import jax
import jax.numpy as jnp
from jax.experimental import pallas as pl
from jax.experimental.pallas import tpu as pltpu


# ----------------------------- model hyper-params (small) -----------------------------
NUM_UNITS = 2
EMBED_DIM = 32          # d_model
N_HEADS = 4
HEAD_DIM = EMBED_DIM // N_HEADS
EXPANSION = 4
FF_DIM = EXPANSION * EMBED_DIM
BATCH = 2
SEQ = 8
LN_EPS = 1e-5


def _layernorm(x, gamma, beta):
    mu = jnp.mean(x, axis=-1, keepdims=True)
    var = jnp.mean((x - mu) ** 2, axis=-1, keepdims=True)
    return (x - mu) * jax.lax.rsqrt(var + LN_EPS) * gamma + beta


# --------------------------- fully fused Encoder Pallas kernel ------------------------
def encoder_fused_kernel(x_ref,
                         wq_ref, bq_ref, wk_ref, bk_ref, wv_ref, bv_ref,
                         wo_ref, bo_ref,
                         g1_ref, be1_ref,
                         w1_ref, bf1_ref, w2_ref, bf2_ref,
                         g2_ref, be2_ref,
                         gf_ref, bf_ref,
                         o_ref,
                         *, num_units, n_heads, head_dim, d_model, batch, seq):
    f32 = jnp.float32
    n_rows = batch * seq
    scale = 1.0 / math.sqrt(float(d_model))      # reference divides by sqrt(d_model)

    x = x_ref[...].astype(f32)                   # (B*S, D)

    for u in range(num_units):                   # static 2-iteration unroll
        # ---- QKV projections on the whole (B*S, D) slab ----
        q = jnp.dot(x, wq_ref[u], preferred_element_type=f32) + bq_ref[u]
        k = jnp.dot(x, wk_ref[u], preferred_element_type=f32) + bk_ref[u]
        v = jnp.dot(x, wv_ref[u], preferred_element_type=f32) + bv_ref[u]
        wo = wo_ref[u]                           # (D, D)

        # ---- attention: batched einsums per head, output projection folded per head ----
        head_sum = None
        for h in range(n_heads):                 # static 4-iteration unroll
            lo = h * head_dim
            qh = q[:, lo:lo + head_dim].reshape(batch, seq, head_dim)
            kh = k[:, lo:lo + head_dim].reshape(batch, seq, head_dim)
            vh = v[:, lo:lo + head_dim].reshape(batch, seq, head_dim)

            s = jnp.einsum("bqd,bkd->bqk", qh, kh,
                           preferred_element_type=f32) * scale      # (B, S, S)
            s = s - jnp.max(s, axis=-1, keepdims=True)
            e = jnp.exp(s)
            p = e * pl.reciprocal(jnp.sum(e, axis=-1, keepdims=True), approx=True)

            oh = jnp.einsum("bqk,bkd->bqd", p, vh,
                            preferred_element_type=f32)              # (B, S, hd)
            # concat_h(o_h) @ Wo  ==  sum_h  o_h @ Wo[h*hd:(h+1)*hd, :]
            contrib = jnp.dot(oh.reshape(n_rows, head_dim),
                              wo[lo:lo + head_dim, :],
                              preferred_element_type=f32)            # (B*S, D)
            head_sum = contrib if head_sum is None else head_sum + contrib

        attn = head_sum + bo_ref[u]

        # ---- residual + LayerNorm 1 ----
        n1 = _layernorm(attn + x, g1_ref[u], be1_ref[u])

        # ---- FFN on the whole slab ----
        h1 = jnp.dot(n1, w1_ref[u], preferred_element_type=f32) + bf1_ref[u]
        h1 = jnp.maximum(h1, 0.0)
        ff = jnp.dot(h1, w2_ref[u], preferred_element_type=f32) + bf2_ref[u]

        # ---- residual + LayerNorm 2 ----
        x = _layernorm(ff + n1, g2_ref[u], be2_ref[u])

    # ---- final encoder LayerNorm, single lane-dense store ----
    o_ref[...] = _layernorm(x, gf_ref[...], bf_ref[...]).astype(o_ref.dtype)


_PARAM_ORDER = ["wq", "bq", "wk", "bk", "wv", "bv", "wo", "bo",
                "g1", "be1", "w1", "bf1", "w2", "bf2", "g2", "be2",
                "gf", "bf"]


def encoder_forward(x, params):
    """x: (B, S, D) f32. params: dict of NUM_UNITS-stacked weights + final LN params."""
    B, S, D = x.shape
    n_rows = B * S
    x_flat = x.reshape(n_rows, D)
    args = [params[name] for name in _PARAM_ORDER]

    kernel = functools.partial(
        encoder_fused_kernel,
        num_units=NUM_UNITS, n_heads=N_HEADS, head_dim=HEAD_DIM,
        d_model=D, batch=B, seq=S)

    vmem_spec = lambda: pl.BlockSpec(memory_space=pltpu.MemorySpace.VMEM)
    out_flat = pl.pallas_call(
        kernel,
        out_shape=jax.ShapeDtypeStruct((n_rows, D), x.dtype),
        in_specs=[vmem_spec() for _ in range(1 + len(args))],
        out_specs=vmem_spec(),
    )(x_flat, *args)
    return out_flat.reshape(B, S, D)


# ------------------------------------ parameter init ----------------------------------
def init_params(key):
    """Deterministic init. Per-head q/k/v Linear(d_model->head_dim) weights are stacked
    column-wise into (D, D) matrices (columns grouped by head, same ordering as the
    torch.cat of per-head outputs).  Per-unit tensors are stacked along a leading
    NUM_UNITS axis; biases / LN params are stored as (1, D) rows for lane-friendly
    broadcasting."""
    def linear(k, fan_in, w_shape, b_shape):
        kw, kb = jax.random.split(k)
        bound = 1.0 / math.sqrt(fan_in)
        w = jax.random.uniform(kw, w_shape, jnp.float32, -bound, bound)
        b = jax.random.uniform(kb, b_shape, jnp.float32, -bound, bound)
        return w, b

    units = []
    for _ in range(NUM_UNITS):
        key, *ks = jax.random.split(key, 7)
        wq, bq = linear(ks[0], EMBED_DIM, (EMBED_DIM, EMBED_DIM), (1, EMBED_DIM))
        wk, bk = linear(ks[1], EMBED_DIM, (EMBED_DIM, EMBED_DIM), (1, EMBED_DIM))
        wv, bv = linear(ks[2], EMBED_DIM, (EMBED_DIM, EMBED_DIM), (1, EMBED_DIM))
        wo, bo = linear(ks[3], EMBED_DIM, (EMBED_DIM, EMBED_DIM), (1, EMBED_DIM))
        w1, bf1 = linear(ks[4], EMBED_DIM, (EMBED_DIM, FF_DIM), (1, FF_DIM))
        w2, bf2 = linear(ks[5], FF_DIM, (FF_DIM, EMBED_DIM), (1, EMBED_DIM))
        units.append(dict(
            wq=wq, bq=bq, wk=wk, bk=bk, wv=wv, bv=bv, wo=wo, bo=bo,
            w1=w1, bf1=bf1, w2=w2, bf2=bf2,
            g1=jnp.ones((1, EMBED_DIM), jnp.float32),
            be1=jnp.zeros((1, EMBED_DIM), jnp.float32),
            g2=jnp.ones((1, EMBED_DIM), jnp.float32),
            be2=jnp.zeros((1, EMBED_DIM), jnp.float32),
        ))
    params = {k: jnp.stack([u[k] for u in units], axis=0) for k in units[0]}
    params["gf"] = jnp.ones((1, EMBED_DIM), jnp.float32)
    params["bf"] = jnp.zeros((1, EMBED_DIM), jnp.float32)
    return params


# -------------------------------- pure-JAX reference ----------------------------------
def encoder_reference(x, params):
    def unit(x, u):
        q = x @ params["wq"][u] + params["bq"][u]
        k = x @ params["wk"][u] + params["bk"][u]
        v = x @ params["wv"][u] + params["bv"][u]
        outs = []
        for h in range(N_HEADS):
            sl = slice(h * HEAD_DIM, (h + 1) * HEAD_DIM)
            s = jnp.einsum("bqd,bkd->bqk", q[..., sl], k[..., sl]) / math.sqrt(EMBED_DIM)
            w = jax.nn.softmax(s, axis=-1)
            outs.append(jnp.einsum("bqk,bkd->bqd", w, v[..., sl]))
        attn = jnp.concatenate(outs, axis=-1) @ params["wo"][u] + params["bo"][u]
        n1 = _layernorm(attn + x, params["g1"][u], params["be1"][u])
        ff = (jnp.maximum(n1 @ params["w1"][u] + params["bf1"][u], 0.0)
              @ params["w2"][u] + params["bf2"][u])
        return _layernorm(ff + n1, params["g2"][u], params["be2"][u])

    for u in range(NUM_UNITS):
        x = unit(x, u)
    return _layernorm(x, params["gf"], params["bf"])


if __name__ == "__main__":
    key = jax.random.PRNGKey(0)
    k_x, k_p = jax.random.split(key)
    x = jax.random.normal(k_x, (BATCH, SEQ, EMBED_DIM), jnp.float32)
    params = init_params(k_p)

    out = jax.block_until_ready(encoder_forward(x, params))

    ref = encoder_reference(x, params)
    assert out.shape == (BATCH, SEQ, EMBED_DIM)
    # 1e-3 tolerance: pl.reciprocal(approx=True) in the softmax denominator has a
    # few-ULP-to-~2^-12 relative error; everything else is exact f32.
    assert jnp.allclose(out, ref, atol=1e-3, rtol=1e-3), "mismatch vs JAX reference"

    print("KERNEL_OK")
</pallas_src>

<mosaic_0001>
module attributes {stable_mosaic.version = 11 : i64} {
  func.func @encoder_fused_kernel(%arg0: memref<16x32xf32, #tpu.memory_space<vmem>>, %arg1: memref<2x32x32xf32, #tpu.memory_space<vmem>>, %arg2: memref<2x1x32xf32, #tpu.memory_space<vmem>>, %arg3: memref<2x32x32xf32, #tpu.memory_space<vmem>>, %arg4: memref<2x1x32xf32, #tpu.memory_space<vmem>>, %arg5: memref<2x32x32xf32, #tpu.memory_space<vmem>>, %arg6: memref<2x1x32xf32, #tpu.memory_space<vmem>>, %arg7: memref<2x32x32xf32, #tpu.memory_space<vmem>>, %arg8: memref<2x1x32xf32, #tpu.memory_space<vmem>>, %arg9: memref<2x1x32xf32, #tpu.memory_space<vmem>>, %arg10: memref<2x1x32xf32, #tpu.memory_space<vmem>>, %arg11: memref<2x32x128xf32, #tpu.memory_space<vmem>>, %arg12: memref<2x1x128xf32, #tpu.memory_space<vmem>>, %arg13: memref<2x128x32xf32, #tpu.memory_space<vmem>>, %arg14: memref<2x1x32xf32, #tpu.memory_space<vmem>>, %arg15: memref<2x1x32xf32, #tpu.memory_space<vmem>>, %arg16: memref<2x1x32xf32, #tpu.memory_space<vmem>>, %arg17: memref<1x32xf32, #tpu.memory_space<vmem>>, %arg18: memref<1x32xf32, #tpu.memory_space<vmem>>, %arg19: memref<16x32xf32, #tpu.memory_space<vmem>>) attributes {dimension_semantics = [], scalar_prefetch = 0 : i64, scratch_operands = 0 : i64, tpu.core_type = #tpu.core_type<tc>} {
    %c0 = arith.constant 0 : index
    %c0_0 = arith.constant 0 : index
    %0 = vector.load %arg0[%c0, %c0_0] : memref<16x32xf32, #tpu.memory_space<vmem>>, vector<16x32xf32>
    %c0_1 = arith.constant 0 : index
    %c0_2 = arith.constant 0 : index
    %c0_3 = arith.constant 0 : index
    %1 = vector.load %arg1[%c0_1, %c0_2, %c0_3] : memref<2x32x32xf32, #tpu.memory_space<vmem>>, vector<1x32x32xf32>
    %2 = vector.shape_cast %1 : vector<1x32x32xf32> to vector<32x32xf32>
    %cst = arith.constant dense<0.000000e+00> : vector<16x32xf32>
    %3 = tpu.matmul %0, %2, %cst {dimension_numbers = #tpu.dot_dimension_numbers<[1], [0], [0], [1], [0, 0, 1, 1], [], []>} : vector<16x32xf32>, vector<32x32xf32>, vector<16x32xf32> -> vector<16x32xf32>
    %c0_4 = arith.constant 0 : index
    %c0_5 = arith.constant 0 : index
    %c0_6 = arith.constant 0 : index
    %4 = vector.load %arg2[%c0_4, %c0_5, %c0_6] : memref<2x1x32xf32, #tpu.memory_space<vmem>>, vector<1x1x32xf32>
    %5 = vector.shape_cast %4 : vector<1x1x32xf32> to vector<1x32xf32>
    %6 = vector.broadcast %5 : vector<1x32xf32> to vector<16x32xf32>
    %7 = arith.addf %3, %6 : vector<16x32xf32>
    %c0_7 = arith.constant 0 : index
    %c0_8 = arith.constant 0 : index
    %c0_9 = arith.constant 0 : index
    %8 = vector.load %arg3[%c0_7, %c0_8, %c0_9] : memref<2x32x32xf32, #tpu.memory_space<vmem>>, vector<1x32x32xf32>
    %9 = vector.shape_cast %8 : vector<1x32x32xf32> to vector<32x32xf32>
    %cst_10 = arith.constant dense<0.000000e+00> : vector<16x32xf32>
    %10 = tpu.matmul %0, %9, %cst_10 {dimension_numbers = #tpu.dot_dimension_numbers<[1], [0], [0], [1], [0, 0, 1, 1], [], []>} : vector<16x32xf32>, vector<32x32xf32>, vector<16x32xf32> -> vector<16x32xf32>
    %c0_11 = arith.constant 0 : index
    %c0_12 = arith.constant 0 : index
    %c0_13 = arith.constant 0 : index
    %11 = vector.load %arg4[%c0_11, %c0_12, %c0_13] : memref<2x1x32xf32, #tpu.memory_space<vmem>>, vector<1x1x32xf32>
    %12 = vector.shape_cast %11 : vector<1x1x32xf32> to vector<1x32xf32>
    %13 = vector.broadcast %12 : vector<1x32xf32> to vector<16x32xf32>
    %14 = arith.addf %10, %13 : vector<16x32xf32>
    %c0_14 = arith.constant 0 : index
    %c0_15 = arith.constant 0 : index
    %c0_16 = arith.constant 0 : index
    %15 = vector.load %arg5[%c0_14, %c0_15, %c0_16] : memref<2x32x32xf32, #tpu.memory_space<vmem>>, vector<1x32x32xf32>
    %16 = vector.shape_cast %15 : vector<1x32x32xf32> to vector<32x32xf32>
    %cst_17 = arith.constant dense<0.000000e+00> : vector<16x32xf32>
    %17 = tpu.matmul %0, %16, %cst_17 {dimension_numbers = #tpu.dot_dimension_numbers<[1], [0], [0], [1], [0, 0, 1, 1], [], []>} : vector<16x32xf32>, vector<32x32xf32>, vector<16x32xf32> -> vector<16x32xf32>
    %c0_18 = arith.constant 0 : index
    %c0_19 = arith.constant 0 : index
    %c0_20 = arith.constant 0 : index
    %18 = vector.load %arg6[%c0_18, %c0_19, %c0_20] : memref<2x1x32xf32, #tpu.memory_space<vmem>>, vector<1x1x32xf32>
    %19 = vector.shape_cast %18 : vector<1x1x32xf32> to vector<1x32xf32>
    %20 = vector.broadcast %19 : vector<1x32xf32> to vector<16x32xf32>
    %21 = arith.addf %17, %20 : vector<16x32xf32>
    %c0_21 = arith.constant 0 : index
    %c0_22 = arith.constant 0 : index
    %c0_23 = arith.constant 0 : index
    %22 = vector.load %arg7[%c0_21, %c0_22, %c0_23] : memref<2x32x32xf32, #tpu.memory_space<vmem>>, vector<1x32x32xf32>
    %23 = vector.shape_cast %22 : vector<1x32x32xf32> to vector<32x32xf32>
    %24 = vector.extract_strided_slice %7 {offsets = [0, 0], sizes = [16, 8], strides = [1, 1]} : vector<16x32xf32> to vector<16x8xf32>
    %25 = vector.shape_cast %24 : vector<16x8xf32> to vector<2x8x8xf32>
    %26 = vector.extract_strided_slice %14 {offsets = [0, 0], sizes = [16, 8], strides = [1, 1]} : vector<16x32xf32> to vector<16x8xf32>
    %27 = vector.shape_cast %26 : vector<16x8xf32> to vector<2x8x8xf32>
    %28 = vector.extract_strided_slice %21 {offsets = [0, 0], sizes = [16, 8], strides = [1, 1]} : vector<16x32xf32> to vector<16x8xf32>
    %29 = vector.shape_cast %28 : vector<16x8xf32> to vector<2x8x8xf32>
    "tpu.trace_start"() <{level = 10 : i32, message = "bqd,bkd->bqk"}> : () -> ()
    %cst_24 = arith.constant dense<0.000000e+00> : vector<2x8x8xf32>
    %30 = tpu.matmul %25, %27, %cst_24 {dimension_numbers = #tpu.dot_dimension_numbers<[2], [2], [1], [1], [0, 0, 0, 1, 1, 1], [0], [0]>} : vector<2x8x8xf32>, vector<2x8x8xf32>, vector<2x8x8xf32> -> vector<2x8x8xf32>
    "tpu.trace_stop"() : () -> ()
    %cst_25 = arith.constant 0.176776692 : f32
    %31 = vector.broadcast %cst_25 : f32 to vector<2x8x8xf32>
    %32 = arith.mulf %30, %31 : vector<2x8x8xf32>
    %cst_26 = arith.constant dense<0xFF800000> : vector<2x8xf32>
    %33 = vector.multi_reduction <maximumf>, %32, %cst_26 [2] : vector<2x8x8xf32> to vector<2x8xf32>
    %34 = vector.shape_cast %33 : vector<2x8xf32> to vector<2x8x1xf32>
    %35 = vector.broadcast %34 : vector<2x8x1xf32> to vector<2x8x8xf32>
    %36 = arith.subf %32, %35 : vector<2x8x8xf32>
    %37 = math.exp %36 : vector<2x8x8xf32>
    %cst_27 = arith.constant dense<0.000000e+00> : vector<2x8xf32>
    %38 = vector.multi_reduction <add>, %37, %cst_27 [2] : vector<2x8x8xf32> to vector<2x8xf32>
    %39 = vector.shape_cast %38 : vector<2x8xf32> to vector<2x8x1xf32>
    %40 = tpu.reciprocal %39 {approx = true} : vector<2x8x1xf32> -> vector<2x8x1xf32>
    %41 = vector.broadcast %40 : vector<2x8x1xf32> to vector<2x8x8xf32>
    %42 = arith.mulf %37, %41 : vector<2x8x8xf32>
    "tpu.trace_start"() <{level = 10 : i32, message = "bqk,bkd->bqd"}> : () -> ()
    %cst_28 = arith.constant dense<0.000000e+00> : vector<2x8x8xf32>
    %43 = tpu.matmul %42, %29, %cst_28 {dimension_numbers = #tpu.dot_dimension_numbers<[2], [1], [1], [2], [0, 0, 0, 1, 1, 2], [0], [0]>} : vector<2x8x8xf32>, vector<2x8x8xf32>, vector<2x8x8xf32> -> vector<2x8x8xf32>
    "tpu.trace_stop"() : () -> ()
    %44 = vector.shape_cast %43 : vector<2x8x8xf32> to vector<16x8xf32>
    %45 = vector.extract_strided_slice %23 {offsets = [0, 0], sizes = [8, 32], strides = [1, 1]} : vector<32x32xf32> to vector<8x32xf32>
    %cst_29 = arith.constant dense<0.000000e+00> : vector<16x32xf32>
    %46 = tpu.matmul %44, %45, %cst_29 {dimension_numbers = #tpu.dot_dimension_numbers<[1], [0], [0], [1], [0, 0, 1, 1], [], []>} : vector<16x8xf32>, vector<8x32xf32>, vector<16x32xf32> -> vector<16x32xf32>
    %47 = vector.extract_strided_slice %7 {offsets = [0, 8], sizes = [16, 8], strides = [1, 1]} : vector<16x32xf32> to vector<16x8xf32>
    %48 = vector.shape_cast %47 : vector<16x8xf32> to vector<2x8x8xf32>
    %49 = vector.extract_strided_slice %14 {offsets = [0, 8], sizes = [16, 8], strides = [1, 1]} : vector<16x32xf32> to vector<16x8xf32>
    %50 = vector.shape_cast %49 : vector<16x8xf32> to vector<2x8x8xf32>
    %51 = vector.extract_strided_slice %21 {offsets = [0, 8], sizes = [16, 8], strides = [1, 1]} : vector<16x32xf32> to vector<16x8xf32>
    %52 = vector.shape_cast %51 : vector<16x8xf32> to vector<2x8x8xf32>
    "tpu.trace_start"() <{level = 10 : i32, message = "bqd,bkd->bqk"}> : () -> ()
    %cst_30 = arith.constant dense<0.000000e+00> : vector<2x8x8xf32>
    %53 = tpu.matmul %48, %50, %cst_30 {dimension_numbers = #tpu.dot_dimension_numbers<[2], [2], [1], [1], [0, 0, 0, 1, 1, 1], [0], [0]>} : vector<2x8x8xf32>, vector<2x8x8xf32>, vector<2x8x8xf32> -> vector<2x8x8xf32>
    "tpu.trace_stop"() : () -> ()
    %cst_31 = arith.constant 0.176776692 : f32
    %54 = vector.broadcast %cst_31 : f32 to vector<2x8x8xf32>
    %55 = arith.mulf %53, %54 : vector<2x8x8xf32>
    %cst_32 = arith.constant dense<0xFF800000> : vector<2x8xf32>
    %56 = vector.multi_reduction <maximumf>, %55, %cst_32 [2] : vector<2x8x8xf32> to vector<2x8xf32>
    %57 = vector.shape_cast %56 : vector<2x8xf32> to vector<2x8x1xf32>
    %58 = vector.broadcast %57 : vector<2x8x1xf32> to vector<2x8x8xf32>
    %59 = arith.subf %55, %58 : vector<2x8x8xf32>
    %60 = math.exp %59 : vector<2x8x8xf32>
    %cst_33 = arith.constant dense<0.000000e+00> : vector<2x8xf32>
    %61 = vector.multi_reduction <add>, %60, %cst_33 [2] : vector<2x8x8xf32> to vector<2x8xf32>
    %62 = vector.shape_cast %61 : vector<2x8xf32> to vector<2x8x1xf32>
    %63 = tpu.reciprocal %62 {approx = true} : vector<2x8x1xf32> -> vector<2x8x1xf32>
    %64 = vector.broadcast %63 : vector<2x8x1xf32> to vector<2x8x8xf32>
    %65 = arith.mulf %60, %64 : vector<2x8x8xf32>
    "tpu.trace_start"() <{level = 10 : i32, message = "bqk,bkd->bqd"}> : () -> ()
    %cst_34 = arith.constant dense<0.000000e+00> : vector<2x8x8xf32>
    %66 = tpu.matmul %65, %52, %cst_34 {dimension_numbers = #tpu.dot_dimension_numbers<[2], [1], [1], [2], [0, 0, 0, 1, 1, 2], [0], [0]>} : vector<2x8x8xf32>, vector<2x8x8xf32>, vector<2x8x8xf32> -> vector<2x8x8xf32>
    "tpu.trace_stop"() : () -> ()
    %67 = vector.shape_cast %66 : vector<2x8x8xf32> to vector<16x8xf32>
    %68 = vector.extract_strided_slice %23 {offsets = [8, 0], sizes = [8, 32], strides = [1, 1]} : vector<32x32xf32> to vector<8x32xf32>
    %cst_35 = arith.constant dense<0.000000e+00> : vector<16x32xf32>
    %69 = tpu.matmul %67, %68, %cst_35 {dimension_numbers = #tpu.dot_dimension_numbers<[1], [0], [0], [1], [0, 0, 1, 1], [], []>} : vector<16x8xf32>, vector<8x32xf32>, vector<16x32xf32> -> vector<16x32xf32>
    %70 = arith.addf %46, %69 : vector<16x32xf32>
    %71 = vector.extract_strided_slice %7 {offsets = [0, 16], sizes = [16, 8], strides = [1, 1]} : vector<16x32xf32> to vector<16x8xf32>
    %72 = vector.shape_cast %71 : vector<16x8xf32> to vector<2x8x8xf32>
    %73 = vector.extract_strided_slice %14 {offsets = [0, 16], sizes = [16, 8], strides = [1, 1]} : vector<16x32xf32> to vector<16x8xf32>
    %74 = vector.shape_cast %73 : vector<16x8xf32> to vector<2x8x8xf32>
    %75 = vector.extract_strided_slice %21 {offsets = [0, 16], sizes = [16, 8], strides = [1, 1]} : vector<16x32xf32> to vector<16x8xf32>
    %76 = vector.shape_cast %75 : vector<16x8xf32> to vector<2x8x8xf32>
    "tpu.trace_start"() <{level = 10 : i32, message = "bqd,bkd->bqk"}> : () -> ()
    %cst_36 = arith.constant dense<0.000000e+00> : vector<2x8x8xf32>
    %77 = tpu.matmul %72, %74, %cst_36 {dimension_numbers = #tpu.dot_dimension_numbers<[2], [2], [1], [1], [0, 0, 0, 1, 1, 1], [0], [0]>} : vector<2x8x8xf32>, vector<2x8x8xf32>, vector<2x8x8xf32> -> vector<2x8x8xf32>
    "tpu.trace_stop"() : () -> ()
    %cst_37 = arith.constant 0.176776692 : f32
    %78 = vector.broadcast %cst_37 : f32 to vector<2x8x8xf32>
    %79 = arith.mulf %77, %78 : vector<2x8x8xf32>
    %cst_38 = arith.constant dense<0xFF800000> : vector<2x8xf32>
    %80 = vector.multi_reduction <maximumf>, %79, %cst_38 [2] : vector<2x8x8xf32> to vector<2x8xf32>
    %81 = vector.shape_cast %80 : vector<2x8xf32> to vector<2x8x1xf32>
    %82 = vector.broadcast %81 : vector<2x8x1xf32> to vector<2x8x8xf32>
    %83 = arith.subf %79, %82 : vector<2x8x8xf32>
    %84 = math.exp %83 : vector<2x8x8xf32>
    %cst_39 = arith.constant dense<0.000000e+00> : vector<2x8xf32>
    %85 = vector.multi_reduction <add>, %84, %cst_39 [2] : vector<2x8x8xf32> to vector<2x8xf32>
    %86 = vector.shape_cast %85 : vector<2x8xf32> to vector<2x8x1xf32>
    %87 = tpu.reciprocal %86 {approx = true} : vector<2x8x1xf32> -> vector<2x8x1xf32>
    %88 = vector.broadcast %87 : vector<2x8x1xf32> to vector<2x8x8xf32>
    %89 = arith.mulf %84, %88 : vector<2x8x8xf32>
    "tpu.trace_start"() <{level = 10 : i32, message = "bqk,bkd->bqd"}> : () -> ()
    %cst_40 = arith.constant dense<0.000000e+00> : vector<2x8x8xf32>
    %90 = tpu.matmul %89, %76, %cst_40 {dimension_numbers = #tpu.dot_dimension_numbers<[2], [1], [1], [2], [0, 0, 0, 1, 1, 2], [0], [0]>} : vector<2x8x8xf32>, vector<2x8x8xf32>, vector<2x8x8xf32> -> vector<2x8x8xf32>
    "tpu.trace_stop"() : () -> ()
    %91 = vector.shape_cast %90 : vector<2x8x8xf32> to vector<16x8xf32>
    %92 = vector.extract_strided_slice %23 {offsets = [16, 0], sizes = [8, 32], strides = [1, 1]} : vector<32x32xf32> to vector<8x32xf32>
    %cst_41 = arith.constant dense<0.000000e+00> : vector<16x32xf32>
    %93 = tpu.matmul %91, %92, %cst_41 {dimension_numbers = #tpu.dot_dimension_numbers<[1], [0], [0], [1], [0, 0, 1, 1], [], []>} : vector<16x8xf32>, vector<8x32xf32>, vector<16x32xf32> -> vector<16x32xf32>
    %94 = arith.addf %70, %93 : vector<16x32xf32>
    %95 = vector.extract_strided_slice %7 {offsets = [0, 24], sizes = [16, 8], strides = [1, 1]} : vector<16x32xf32> to vector<16x8xf32>
    %96 = vector.shape_cast %95 : vector<16x8xf32> to vector<2x8x8xf32>
    %97 = vector.extract_strided_slice %14 {offsets = [0, 24], sizes = [16, 8], strides = [1, 1]} : vector<16x32xf32> to vector<16x8xf32>
    %98 = vector.shape_cast %97 : vector<16x8xf32> to vector<2x8x8xf32>
    %99 = vector.extract_strided_slice %21 {offsets = [0, 24], sizes = [16, 8], strides = [1, 1]} : vector<16x32xf32> to vector<16x8xf32>
    %100 = vector.shape_cast %99 : vector<16x8xf32> to vector<2x8x8xf32>
    "tpu.trace_start"() <{level = 10 : i32, message = "bqd,bkd->bqk"}> : () -> ()
    %cst_42 = arith.constant dense<0.000000e+00> : vector<2x8x8xf32>
    %101 = tpu.matmul %96, %98, %cst_42 {dimension_numbers = #tpu.dot_dimension_numbers<[2], [2], [1], [1], [0, 0, 0, 1, 1, 1], [0], [0]>} : vector<2x8x8xf32>, vector<2x8x8xf32>, vector<2x8x8xf32> -> vector<2x8x8xf32>
    "tpu.trace_stop"() : () -> ()
    %cst_43 = arith.constant 0.176776692 : f32
    %102 = vector.broadcast %cst_43 : f32 to vector<2x8x8xf32>
    %103 = arith.mulf %101, %102 : vector<2x8x8xf32>
    %cst_44 = arith.constant dense<0xFF800000> : vector<2x8xf32>
    %104 = vector.multi_reduction <maximumf>, %103, %cst_44 [2] : vector<2x8x8xf32> to vector<2x8xf32>
    %105 = vector.shape_cast %104 : vector<2x8xf32> to vector<2x8x1xf32>
    %106 = vector.broadcast %105 : vector<2x8x1xf32> to vector<2x8x8xf32>
    %107 = arith.subf %103, %106 : vector<2x8x8xf32>
    %108 = math.exp %107 : vector<2x8x8xf32>
    %cst_45 = arith.constant dense<0.000000e+00> : vector<2x8xf32>
    %109 = vector.multi_reduction <add>, %108, %cst_45 [2] : vector<2x8x8xf32> to vector<2x8xf32>
    %110 = vector.shape_cast %109 : vector<2x8xf32> to vector<2x8x1xf32>
    %111 = tpu.reciprocal %110 {approx = true} : vector<2x8x1xf32> -> vector<2x8x1xf32>
    %112 = vector.broadcast %111 : vector<2x8x1xf32> to vector<2x8x8xf32>
    %113 = arith.mulf %108, %112 : vector<2x8x8xf32>
    "tpu.trace_start"() <{level = 10 : i32, message = "bqk,bkd->bqd"}> : () -> ()
    %cst_46 = arith.constant dense<0.000000e+00> : vector<2x8x8xf32>
    %114 = tpu.matmul %113, %100, %cst_46 {dimension_numbers = #tpu.dot_dimension_numbers<[2], [1], [1], [2], [0, 0, 0, 1, 1, 2], [0], [0]>} : vector<2x8x8xf32>, vector<2x8x8xf32>, vector<2x8x8xf32> -> vector<2x8x8xf32>
    "tpu.trace_stop"() : () -> ()
    %115 = vector.shape_cast %114 : vector<2x8x8xf32> to vector<16x8xf32>
    %116 = vector.extract_strided_slice %23 {offsets = [24, 0], sizes = [8, 32], strides = [1, 1]} : vector<32x32xf32> to vector<8x32xf32>
    %cst_47 = arith.constant dense<0.000000e+00> : vector<16x32xf32>
    %117 = tpu.matmul %115, %116, %cst_47 {dimension_numbers = #tpu.dot_dimension_numbers<[1], [0], [0], [1], [0, 0, 1, 1], [], []>} : vector<16x8xf32>, vector<8x32xf32>, vector<16x32xf32> -> vector<16x32xf32>
    %118 = arith.addf %94, %117 : vector<16x32xf32>
    %c0_48 = arith.constant 0 : index
    %c0_49 = arith.constant 0 : index
    %c0_50 = arith.constant 0 : index
    %119 = vector.load %arg8[%c0_48, %c0_49, %c0_50] : memref<2x1x32xf32, #tpu.memory_space<vmem>>, vector<1x1x32xf32>
    %120 = vector.shape_cast %119 : vector<1x1x32xf32> to vector<1x32xf32>
    %121 = vector.broadcast %120 : vector<1x32xf32> to vector<16x32xf32>
    %122 = arith.addf %118, %121 : vector<16x32xf32>
    %123 = arith.addf %122, %0 : vector<16x32xf32>
    %c0_51 = arith.constant 0 : index
    %c0_52 = arith.constant 0 : index
    %c0_53 = arith.constant 0 : index
    %124 = vector.load %arg9[%c0_51, %c0_52, %c0_53] : memref<2x1x32xf32, #tpu.memory_space<vmem>>, vector<1x1x32xf32>
    %125 = vector.shape_cast %124 : vector<1x1x32xf32> to vector<1x32xf32>
    %c0_54 = arith.constant 0 : index
    %c0_55 = arith.constant 0 : index
    %c0_56 = arith.constant 0 : index
    %126 = vector.load %arg10[%c0_54, %c0_55, %c0_56] : memref<2x1x32xf32, #tpu.memory_space<vmem>>, vector<1x1x32xf32>
    %127 = vector.shape_cast %126 : vector<1x1x32xf32> to vector<1x32xf32>
    %cst_57 = arith.constant dense<0.000000e+00> : vector<16xf32>
    %128 = vector.multi_reduction <add>, %123, %cst_57 [1] : vector<16x32xf32> to vector<16xf32>
    %129 = vector.shape_cast %128 : vector<16xf32> to vector<16x1xf32>
    %cst_58 = arith.constant 3.200000e+01 : f32
    %130 = vector.broadcast %cst_58 : f32 to vector<16x1xf32>
    %131 = arith.divf %129, %130 : vector<16x1xf32>
    %132 = vector.broadcast %131 : vector<16x1xf32> to vector<16x32xf32>
    %133 = arith.subf %123, %132 : vector<16x32xf32>
    %134 = arith.mulf %133, %133 : vector<16x32xf32>
    %cst_59 = arith.constant dense<0.000000e+00> : vector<16xf32>
    %135 = vector.multi_reduction <add>, %134, %cst_59 [1] : vector<16x32xf32> to vector<16xf32>
    %136 = vector.shape_cast %135 : vector<16xf32> to vector<16x1xf32>
    %cst_60 = arith.constant 3.200000e+01 : f32
    %137 = vector.broadcast %cst_60 : f32 to vector<16x1xf32>
    %138 = arith.divf %136, %137 : vector<16x1xf32>
    %139 = vector.broadcast %131 : vector<16x1xf32> to vector<16x32xf32>
    %140 = arith.subf %123, %139 : vector<16x32xf32>
    %cst_61 = arith.constant 9.99999974E-6 : f32
    %141 = vector.broadcast %cst_61 : f32 to vector<16x1xf32>
    %142 = arith.addf %138, %141 : vector<16x1xf32>
    %143 = math.rsqrt %142 : vector<16x1xf32>
    %144 = vector.broadcast %143 : vector<16x1xf32> to vector<16x32xf32>
    %145 = arith.mulf %140, %144 : vector<16x32xf32>
    %146 = vector.broadcast %125 : vector<1x32xf32> to vector<16x32xf32>
    %147 = arith.mulf %145, %146 : vector<16x32xf32>
    %148 = vector.broadcast %127 : vector<1x32xf32> to vector<16x32xf32>
    %149 = arith.addf %147, %148 : vector<16x32xf32>
    %c0_62 = arith.constant 0 : index
    %c0_63 = arith.constant 0 : index
    %c0_64 = arith.constant 0 : index
    %150 = vector.load %arg11[%c0_62, %c0_63, %c0_64] : memref<2x32x128xf32, #tpu.memory_space<vmem>>, vector<1x32x128xf32>
    %151 = vector.shape_cast %150 : vector<1x32x128xf32> to vector<32x128xf32>
    %cst_65 = arith.constant dense<0.000000e+00> : vector<16x128xf32>
    %152 = tpu.matmul %149, %151, %cst_65 {dimension_numbers = #tpu.dot_dimension_numbers<[1], [0], [0], [1], [0, 0, 1, 1], [], []>} : vector<16x32xf32>, vector<32x128xf32>, vector<16x128xf32> -> vector<16x128xf32>
    %c0_66 = arith.constant 0 : index
    %c0_67 = arith.constant 0 : index
    %c0_68 = arith.constant 0 : index
    %153 = vector.load %arg12[%c0_66, %c0_67, %c0_68] : memref<2x1x128xf32, #tpu.memory_space<vmem>>, vector<1x1x128xf32>
    %154 = vector.shape_cast %153 : vector<1x1x128xf32> to vector<1x128xf32>
    %155 = vector.broadcast %154 : vector<1x128xf32> to vector<16x128xf32>
    %156 = arith.addf %152, %155 : vector<16x128xf32>
    %cst_69 = arith.constant 0.000000e+00 : f32
    %157 = vector.broadcast %cst_69 : f32 to vector<16x128xf32>
    %158 = arith.maximumf %156, %157 : vector<16x128xf32>
    %c0_70 = arith.constant 0 : index
    %c0_71 = arith.constant 0 : index
    %c0_72 = arith.constant 0 : index
    %159 = vector.load %arg13[%c0_70, %c0_71, %c0_72] : memref<2x128x32xf32, #tpu.memory_space<vmem>>, vector<1x128x32xf32>
    %160 = vector.shape_cast %159 : vector<1x128x32xf32> to vector<128x32xf32>
    %cst_73 = arith.constant dense<0.000000e+00> : vector<16x32xf32>
    %161 = tpu.matmul %158, %160, %cst_73 {dimension_numbers = #tpu.dot_dimension_numbers<[1], [0], [0], [1], [0, 0, 1, 1], [], []>} : vector<16x128xf32>, vector<128x32xf32>, vector<16x32xf32> -> vector<16x32xf32>
    %c0_74 = arith.constant 0 : index
    %c0_75 = arith.constant 0 : index
    %c0_76 = arith.constant 0 : index
    %162 = vector.load %arg14[%c0_74, %c0_75, %c0_76] : memref<2x1x32xf32, #tpu.memory_space<vmem>>, vector<1x1x32xf32>
    %163 = vector.shape_cast %162 : vector<1x1x32xf32> to vector<1x32xf32>
    %164 = vector.broadcast %163 : vector<1x32xf32> to vector<16x32xf32>
    %165 = arith.addf %161, %164 : vector<16x32xf32>
    %166 = arith.addf %165, %149 : vector<16x32xf32>
    %c0_77 = arith.constant 0 : index
    %c0_78 = arith.constant 0 : index
    %c0_79 = arith.constant 0 : index
    %167 = vector.load %arg15[%c0_77, %c0_78, %c0_79] : memref<2x1x32xf32, #tpu.memory_space<vmem>>, vector<1x1x32xf32>
    %168 = vector.shape_cast %167 : vector<1x1x32xf32> to vector<1x32xf32>
    %c0_80 = arith.constant 0 : index
    %c0_81 = arith.constant 0 : index
    %c0_82 = arith.constant 0 : index
    %169 = vector.load %arg16[%c0_80, %c0_81, %c0_82] : memref<2x1x32xf32, #tpu.memory_space<vmem>>, vector<1x1x32xf32>
    %170 = vector.shape_cast %169 : vector<1x1x32xf32> to vector<1x32xf32>
    %cst_83 = arith.constant dense<0.000000e+00> : vector<16xf32>
    %171 = vector.multi_reduction <add>, %166, %cst_83 [1] : vector<16x32xf32> to vector<16xf32>
    %172 = vector.shape_cast %171 : vector<16xf32> to vector<16x1xf32>
    %cst_84 = arith.constant 3.200000e+01 : f32
    %173 = vector.broadcast %cst_84 : f32 to vector<16x1xf32>
    %174 = arith.divf %172, %173 : vector<16x1xf32>
    %175 = vector.broadcast %174 : vector<16x1xf32> to vector<16x32xf32>
    %176 = arith.subf %166, %175 : vector<16x32xf32>
    %177 = arith.mulf %176, %176 : vector<16x32xf32>
    %cst_85 = arith.constant dense<0.000000e+00> : vector<16xf32>
    %178 = vector.multi_reduction <add>, %177, %cst_85 [1] : vector<16x32xf32> to vector<16xf32>
    %179 = vector.shape_cast %178 : vector<16xf32> to vector<16x1xf32>
    %cst_86 = arith.constant 3.200000e+01 : f32
    %180 = vector.broadcast %cst_86 : f32 to vector<16x1xf32>
    %181 = arith.divf %179, %180 : vector<16x1xf32>
    %182 = vector.broadcast %174 : vector<16x1xf32> to vector<16x32xf32>
    %183 = arith.subf %166, %182 : vector<16x32xf32>
    %cst_87 = arith.constant 9.99999974E-6 : f32
    %184 = vector.broadcast %cst_87 : f32 to vector<16x1xf32>
    %185 = arith.addf %181, %184 : vector<16x1xf32>
    %186 = math.rsqrt %185 : vector<16x1xf32>
    %187 = vector.broadcast %186 : vector<16x1xf32> to vector<16x32xf32>
    %188 = arith.mulf %183, %187 : vector<16x32xf32>
    %189 = vector.broadcast %168 : vector<1x32xf32> to vector<16x32xf32>
    %190 = arith.mulf %188, %189 : vector<16x32xf32>
    %191 = vector.broadcast %170 : vector<1x32xf32> to vector<16x32xf32>
    %192 = arith.addf %190, %191 : vector<16x32xf32>
    %c1 = arith.constant 1 : index
    %c0_88 = arith.constant 0 : index
    %c0_89 = arith.constant 0 : index
    %193 = vector.load %arg1[%c1, %c0_88, %c0_89] : memref<2x32x32xf32, #tpu.memory_space<vmem>>, vector<1x32x32xf32>
    %194 = vector.shape_cast %193 : vector<1x32x32xf32> to vector<32x32xf32>
    %cst_90 = arith.constant dense<0.000000e+00> : vector<16x32xf32>
    %195 = tpu.matmul %192, %194, %cst_90 {dimension_numbers = #tpu.dot_dimension_numbers<[1], [0], [0], [1], [0, 0, 1, 1], [], []>} : vector<16x32xf32>, vector<32x32xf32>, vector<16x32xf32> -> vector<16x32xf32>
    %c1_91 = arith.constant 1 : index
    %c0_92 = arith.constant 0 : index
    %c0_93 = arith.constant 0 : index
    %196 = vector.load %arg2[%c1_91, %c0_92, %c0_93] : memref<2x1x32xf32, #tpu.memory_space<vmem>>, vector<1x1x32xf32>
    %197 = vector.shape_cast %196 : vector<1x1x32xf32> to vector<1x32xf32>
    %198 = vector.broadcast %197 : vector<1x32xf32> to vector<16x32xf32>
    %199 = arith.addf %195, %198 : vector<16x32xf32>
    %c1_94 = arith.constant 1 : index
    %c0_95 = arith.constant 0 : index
    %c0_96 = arith.constant 0 : index
    %200 = vector.load %arg3[%c1_94, %c0_95, %c0_96] : memref<2x32x32xf32, #tpu.memory_space<vmem>>, vector<1x32x32xf32>
    %201 = vector.shape_cast %200 : vector<1x32x32xf32> to vector<32x32xf32>
    %cst_97 = arith.constant dense<0.000000e+00> : vector<16x32xf32>
    %202 = tpu.matmul %192, %201, %cst_97 {dimension_numbers = #tpu.dot_dimension_numbers<[1], [0], [0], [1], [0, 0, 1, 1], [], []>} : vector<16x32xf32>, vector<32x32xf32>, vector<16x32xf32> -> vector<16x32xf32>
    %c1_98 = arith.constant 1 : index
    %c0_99 = arith.constant 0 : index
    %c0_100 = arith.constant 0 : index
    %203 = vector.load %arg4[%c1_98, %c0_99, %c0_100] : memref<2x1x32xf32, #tpu.memory_space<vmem>>, vector<1x1x32xf32>
    %204 = vector.shape_cast %203 : vector<1x1x32xf32> to vector<1x32xf32>
    %205 = vector.broadcast %204 : vector<1x32xf32> to vector<16x32xf32>
    %206 = arith.addf %202, %205 : vector<16x32xf32>
    %c1_101 = arith.constant 1 : index
    %c0_102 = arith.constant 0 : index
    %c0_103 = arith.constant 0 : index
    %207 = vector.load %arg5[%c1_101, %c0_102, %c0_103] : memref<2x32x32xf32, #tpu.memory_space<vmem>>, vector<1x32x32xf32>
    %208 = vector.shape_cast %207 : vector<1x32x32xf32> to vector<32x32xf32>
    %cst_104 = arith.constant dense<0.000000e+00> : vector<16x32xf32>
    %209 = tpu.matmul %192, %208, %cst_104 {dimension_numbers = #tpu.dot_dimension_numbers<[1], [0], [0], [1], [0, 0, 1, 1], [], []>} : vector<16x32xf32>, vector<32x32xf32>, vector<16x32xf32> -> vector<16x32xf32>
    %c1_105 = arith.constant 1 : index
    %c0_106 = arith.constant 0 : index
    %c0_107 = arith.constant 0 : index
    %210 = vector.load %arg6[%c1_105, %c0_106, %c0_107] : memref<2x1x32xf32, #tpu.memory_space<vmem>>, vector<1x1x32xf32>
    %211 = vector.shape_cast %210 : vector<1x1x32xf32> to vector<1x32xf32>
    %212 = vector.broadcast %211 : vector<1x32xf32> to vector<16x32xf32>
    %213 = arith.addf %209, %212 : vector<16x32xf32>
    %c1_108 = arith.constant 1 : index
    %c0_109 = arith.constant 0 : index
    %c0_110 = arith.constant 0 : index
    %214 = vector.load %arg7[%c1_108, %c0_109, %c0_110] : memref<2x32x32xf32, #tpu.memory_space<vmem>>, vector<1x32x32xf32>
    %215 = vector.shape_cast %214 : vector<1x32x32xf32> to vector<32x32xf32>
    %216 = vector.extract_strided_slice %199 {offsets = [0, 0], sizes = [16, 8], strides = [1, 1]} : vector<16x32xf32> to vector<16x8xf32>
    %217 = vector.shape_cast %216 : vector<16x8xf32> to vector<2x8x8xf32>
    %218 = vector.extract_strided_slice %206 {offsets = [0, 0], sizes = [16, 8], strides = [1, 1]} : vector<16x32xf32> to vector<16x8xf32>
    %219 = vector.shape_cast %218 : vector<16x8xf32> to vector<2x8x8xf32>
    %220 = vector.extract_strided_slice %213 {offsets = [0, 0], sizes = [16, 8], strides = [1, 1]} : vector<16x32xf32> to vector<16x8xf32>
    %221 = vector.shape_cast %220 : vector<16x8xf32> to vector<2x8x8xf32>
    "tpu.trace_start"() <{level = 10 : i32, message = "bqd,bkd->bqk"}> : () -> ()
    %cst_111 = arith.constant dense<0.000000e+00> : vector<2x8x8xf32>
    %222 = tpu.matmul %217, %219, %cst_111 {dimension_numbers = #tpu.dot_dimension_numbers<[2], [2], [1], [1], [0, 0, 0, 1, 1, 1], [0], [0]>} : vector<2x8x8xf32>, vector<2x8x8xf32>, vector<2x8x8xf32> -> vector<2x8x8xf32>
    "tpu.trace_stop"() : () -> ()
    %cst_112 = arith.constant 0.176776692 : f32
    %223 = vector.broadcast %cst_112 : f32 to vector<2x8x8xf32>
    %224 = arith.mulf %222, %223 : vector<2x8x8xf32>
    %cst_113 = arith.constant dense<0xFF800000> : vector<2x8xf32>
    %225 = vector.multi_reduction <maximumf>, %224, %cst_113 [2] : vector<2x8x8xf32> to vector<2x8xf32>
    %226 = vector.shape_cast %225 : vector<2x8xf32> to vector<2x8x1xf32>
    %227 = vector.broadcast %226 : vector<2x8x1xf32> to vector<2x8x8xf32>
    %228 = arith.subf %224, %227 : vector<2x8x8xf32>
    %229 = math.exp %228 : vector<2x8x8xf32>
    %cst_114 = arith.constant dense<0.000000e+00> : vector<2x8xf32>
    %230 = vector.multi_reduction <add>, %229, %cst_114 [2] : vector<2x8x8xf32> to vector<2x8xf32>
    %231 = vector.shape_cast %230 : vector<2x8xf32> to vector<2x8x1xf32>
    %232 = tpu.reciprocal %231 {approx = true} : vector<2x8x1xf32> -> vector<2x8x1xf32>
    %233 = vector.broadcast %232 : vector<2x8x1xf32> to vector<2x8x8xf32>
    %234 = arith.mulf %229, %233 : vector<2x8x8xf32>
    "tpu.trace_start"() <{level = 10 : i32, message = "bqk,bkd->bqd"}> : () -> ()
    %cst_115 = arith.constant dense<0.000000e+00> : vector<2x8x8xf32>
    %235 = tpu.matmul %234, %221, %cst_115 {dimension_numbers = #tpu.dot_dimension_numbers<[2], [1], [1], [2], [0, 0, 0, 1, 1, 2], [0], [0]>} : vector<2x8x8xf32>, vector<2x8x8xf32>, vector<2x8x8xf32> -> vector<2x8x8xf32>
    "tpu.trace_stop"() : () -> ()
    %236 = vector.shape_cast %235 : vector<2x8x8xf32> to vector<16x8xf32>
    %237 = vector.extract_strided_slice %215 {offsets = [0, 0], sizes = [8, 32], strides = [1, 1]} : vector<32x32xf32> to vector<8x32xf32>
    %cst_116 = arith.constant dense<0.000000e+00> : vector<16x32xf32>
    %238 = tpu.matmul %236, %237, %cst_116 {dimension_numbers = #tpu.dot_dimension_numbers<[1], [0], [0], [1], [0, 0, 1, 1], [], []>} : vector<16x8xf32>, vector<8x32xf32>, vector<16x32xf32> -> vector<16x32xf32>
    %239 = vector.extract_strided_slice %199 {offsets = [0, 8], sizes = [16, 8], strides = [1, 1]} : vector<16x32xf32> to vector<16x8xf32>
    %240 = vector.shape_cast %239 : vector<16x8xf32> to vector<2x8x8xf32>
    %241 = vector.extract_strided_slice %206 {offsets = [0, 8], sizes = [16, 8], strides = [1, 1]} : vector<16x32xf32> to vector<16x8xf32>
    %242 = vector.shape_cast %241 : vector<16x8xf32> to vector<2x8x8xf32>
    %243 = vector.extract_strided_slice %213 {offsets = [0, 8], sizes = [16, 8], strides = [1, 1]} : vector<16x32xf32> to vector<16x8xf32>
    %244 = vector.shape_cast %243 : vector<16x8xf32> to vector<2x8x8xf32>
    "tpu.trace_start"() <{level = 10 : i32, message = "bqd,bkd->bqk"}> : () -> ()
    %cst_117 = arith.constant dense<0.000000e+00> : vector<2x8x8xf32>
    %245 = tpu.matmul %240, %242, %cst_117 {dimension_numbers = #tpu.dot_dimension_numbers<[2], [2], [1], [1], [0, 0, 0, 1, 1, 1], [0], [0]>} : vector<2x8x8xf32>, vector<2x8x8xf32>, vector<2x8x8xf32> -> vector<2x8x8xf32>
    "tpu.trace_stop"() : () -> ()
    %cst_118 = arith.constant 0.176776692 : f32
    %246 = vector.broadcast %cst_118 : f32 to vector<2x8x8xf32>
    %247 = arith.mulf %245, %246 : vector<2x8x8xf32>
    %cst_119 = arith.constant dense<0xFF800000> : vector<2x8xf32>
    %248 = vector.multi_reduction <maximumf>, %247, %cst_119 [2] : vector<2x8x8xf32> to vector<2x8xf32>
    %249 = vector.shape_cast %248 : vector<2x8xf32> to vector<2x8x1xf32>
    %250 = vector.broadcast %249 : vector<2x8x1xf32> to vector<2x8x8xf32>
    %251 = arith.subf %247, %250 : vector<2x8x8xf32>
    %252 = math.exp %251 : vector<2x8x8xf32>
    %cst_120 = arith.constant dense<0.000000e+00> : vector<2x8xf32>
    %253 = vector.multi_reduction <add>, %252, %cst_120 [2] : vector<2x8x8xf32> to vector<2x8xf32>
    %254 = vector.shape_cast %253 : vector<2x8xf32> to vector<2x8x1xf32>
    %255 = tpu.reciprocal %254 {approx = true} : vector<2x8x1xf32> -> vector<2x8x1xf32>
    %256 = vector.broadcast %255 : vector<2x8x1xf32> to vector<2x8x8xf32>
    %257 = arith.mulf %252, %256 : vector<2x8x8xf32>
    "tpu.trace_start"() <{level = 10 : i32, message = "bqk,bkd->bqd"}> : () -> ()
    %cst_121 = arith.constant dense<0.000000e+00> : vector<2x8x8xf32>
    %258 = tpu.matmul %257, %244, %cst_121 {dimension_numbers = #tpu.dot_dimension_numbers<[2], [1], [1], [2], [0, 0, 0, 1, 1, 2], [0], [0]>} : vector<2x8x8xf32>, vector<2x8x8xf32>, vector<2x8x8xf32> -> vector<2x8x8xf32>
    "tpu.trace_stop"() : () -> ()
    %259 = vector.shape_cast %258 : vector<2x8x8xf32> to vector<16x8xf32>
    %260 = vector.extract_strided_slice %215 {offsets = [8, 0], sizes = [8, 32], strides = [1, 1]} : vector<32x32xf32> to vector<8x32xf32>
    %cst_122 = arith.constant dense<0.000000e+00> : vector<16x32xf32>
    %261 = tpu.matmul %259, %260, %cst_122 {dimension_numbers = #tpu.dot_dimension_numbers<[1], [0], [0], [1], [0, 0, 1, 1], [], []>} : vector<16x8xf32>, vector<8x32xf32>, vector<16x32xf32> -> vector<16x32xf32>
    %262 = arith.addf %238, %261 : vector<16x32xf32>
    %263 = vector.extract_strided_slice %199 {offsets = [0, 16], sizes = [16, 8], strides = [1, 1]} : vector<16x32xf32> to vector<16x8xf32>
    %264 = vector.shape_cast %263 : vector<16x8xf32> to vector<2x8x8xf32>
    %265 = vector.extract_strided_slice %206 {offsets = [0, 16], sizes = [16, 8], strides = [1, 1]} : vector<16x32xf32> to vector<16x8xf32>
    %266 = vector.shape_cast %265 : vector<16x8xf32> to vector<2x8x8xf32>
    %267 = vector.extract_strided_slice %213 {offsets = [0, 16], sizes = [16, 8], strides = [1, 1]} : vector<16x32xf32> to vector<16x8xf32>
    %268 = vector.shape_cast %267 : vector<16x8xf32> to vector<2x8x8xf32>
    "tpu.trace_start"() <{level = 10 : i32, message = "bqd,bkd->bqk"}> : () -> ()
    %cst_123 = arith.constant dense<0.000000e+00> : vector<2x8x8xf32>
    %269 = tpu.matmul %264, %266, %cst_123 {dimension_numbers = #tpu.dot_dimension_numbers<[2], [2], [1], [1], [0, 0, 0, 1, 1, 1], [0], [0]>} : vector<2x8x8xf32>, vector<2x8x8xf32>, vector<2x8x8xf32> -> vector<2x8x8xf32>
    "tpu.trace_stop"() : () -> ()
    %cst_124 = arith.constant 0.176776692 : f32
    %270 = vector.broadcast %cst_124 : f32 to vector<2x8x8xf32>
    %271 = arith.mulf %269, %270 : vector<2x8x8xf32>
    %cst_125 = arith.constant dense<0xFF800000> : vector<2x8xf32>
    %272 = vector.multi_reduction <maximumf>, %271, %cst_125 [2] : vector<2x8x8xf32> to vector<2x8xf32>
    %273 = vector.shape_cast %272 : vector<2x8xf32> to vector<2x8x1xf32>
    %274 = vector.broadcast %273 : vector<2x8x1xf32> to vector<2x8x8xf32>
    %275 = arith.subf %271, %274 : vector<2x8x8xf32>
    %276 = math.exp %275 : vector<2x8x8xf32>
    %cst_126 = arith.constant dense<0.000000e+00> : vector<2x8xf32>
    %277 = vector.multi_reduction <add>, %276, %cst_126 [2] : vector<2x8x8xf32> to vector<2x8xf32>
    %278 = vector.shape_cast %277 : vector<2x8xf32> to vector<2x8x1xf32>
    %279 = tpu.reciprocal %278 {approx = true} : vector<2x8x1xf32> -> vector<2x8x1xf32>
    %280 = vector.broadcast %279 : vector<2x8x1xf32> to vector<2x8x8xf32>
    %281 = arith.mulf %276, %280 : vector<2x8x8xf32>
    "tpu.trace_start"() <{level = 10 : i32, message = "bqk,bkd->bqd"}> : () -> ()
    %cst_127 = arith.constant dense<0.000000e+00> : vector<2x8x8xf32>
    %282 = tpu.matmul %281, %268, %cst_127 {dimension_numbers = #tpu.dot_dimension_numbers<[2], [1], [1], [2], [0, 0, 0, 1, 1, 2], [0], [0]>} : vector<2x8x8xf32>, vector<2x8x8xf32>, vector<2x8x8xf32> -> vector<2x8x8xf32>
    "tpu.trace_stop"() : () -> ()
    %283 = vector.shape_cast %282 : vector<2x8x8xf32> to vector<16x8xf32>
    %284 = vector.extract_strided_slice %215 {offsets = [16, 0], sizes = [8, 32], strides = [1, 1]} : vector<32x32xf32> to vector<8x32xf32>
    %cst_128 = arith.constant dense<0.000000e+00> : vector<16x32xf32>
    %285 = tpu.matmul %283, %284, %cst_128 {dimension_numbers = #tpu.dot_dimension_numbers<[1], [0], [0], [1], [0, 0, 1, 1], [], []>} : vector<16x8xf32>, vector<8x32xf32>, vector<16x32xf32> -> vector<16x32xf32>
    %286 = arith.addf %262, %285 : vector<16x32xf32>
    %287 = vector.extract_strided_slice %199 {offsets = [0, 24], sizes = [16, 8], strides = [1, 1]} : vector<16x32xf32> to vector<16x8xf32>
    %288 = vector.shape_cast %287 : vector<16x8xf32> to vector<2x8x8xf32>
    %289 = vector.extract_strided_slice %206 {offsets = [0, 24], sizes = [16, 8], strides = [1, 1]} : vector<16x32xf32> to vector<16x8xf32>
    %290 = vector.shape_cast %289 : vector<16x8xf32> to vector<2x8x8xf32>
    %291 = vector.extract_strided_slice %213 {offsets = [0, 24], sizes = [16, 8], strides = [1, 1]} : vector<16x32xf32> to vector<16x8xf32>
    %292 = vector.shape_cast %291 : vector<16x8xf32> to vector<2x8x8xf32>
    "tpu.trace_start"() <{level = 10 : i32, message = "bqd,bkd->bqk"}> : () -> ()
    %cst_129 = arith.constant dense<0.000000e+00> : vector<2x8x8xf32>
    %293 = tpu.matmul %288, %290, %cst_129 {dimension_numbers = #tpu.dot_dimension_numbers<[2], [2], [1], [1], [0, 0, 0, 1, 1, 1], [0], [0]>} : vector<2x8x8xf32>, vector<2x8x8xf32>, vector<2x8x8xf32> -> vector<2x8x8xf32>
    "tpu.trace_stop"() : () -> ()
    %cst_130 = arith.constant 0.176776692 : f32
    %294 = vector.broadcast %cst_130 : f32 to vector<2x8x8xf32>
    %295 = arith.mulf %293, %294 : vector<2x8x8xf32>
    %cst_131 = arith.constant dense<0xFF800000> : vector<2x8xf32>
    %296 = vector.multi_reduction <maximumf>, %295, %cst_131 [2] : vector<2x8x8xf32> to vector<2x8xf32>
    %297 = vector.shape_cast %296 : vector<2x8xf32> to vector<2x8x1xf32>
    %298 = vector.broadcast %297 : vector<2x8x1xf32> to vector<2x8x8xf32>
    %299 = arith.subf %295, %298 : vector<2x8x8xf32>
    %300 = math.exp %299 : vector<2x8x8xf32>
    %cst_132 = arith.constant dense<0.000000e+00> : vector<2x8xf32>
    %301 = vector.multi_reduction <add>, %300, %cst_132 [2] : vector<2x8x8xf32> to vector<2x8xf32>
    %302 = vector.shape_cast %301 : vector<2x8xf32> to vector<2x8x1xf32>
    %303 = tpu.reciprocal %302 {approx = true} : vector<2x8x1xf32> -> vector<2x8x1xf32>
    %304 = vector.broadcast %303 : vector<2x8x1xf32> to vector<2x8x8xf32>
    %305 = arith.mulf %300, %304 : vector<2x8x8xf32>
    "tpu.trace_start"() <{level = 10 : i32, message = "bqk,bkd->bqd"}> : () -> ()
    %cst_133 = arith.constant dense<0.000000e+00> : vector<2x8x8xf32>
    %306 = tpu.matmul %305, %292, %cst_133 {dimension_numbers = #tpu.dot_dimension_numbers<[2], [1], [1], [2], [0, 0, 0, 1, 1, 2], [0], [0]>} : vector<2x8x8xf32>, vector<2x8x8xf32>, vector<2x8x8xf32> -> vector<2x8x8xf32>
    "tpu.trace_stop"() : () -> ()
    %307 = vector.shape_cast %306 : vector<2x8x8xf32> to vector<16x8xf32>
    %308 = vector.extract_strided_slice %215 {offsets = [24, 0], sizes = [8, 32], strides = [1, 1]} : vector<32x32xf32> to vector<8x32xf32>
    %cst_134 = arith.constant dense<0.000000e+00> : vector<16x32xf32>
    %309 = tpu.matmul %307, %308, %cst_134 {dimension_numbers = #tpu.dot_dimension_numbers<[1], [0], [0], [1], [0, 0, 1, 1], [], []>} : vector<16x8xf32>, vector<8x32xf32>, vector<16x32xf32> -> vector<16x32xf32>
    %310 = arith.addf %286, %309 : vector<16x32xf32>
    %c1_135 = arith.constant 1 : index
    %c0_136 = arith.constant 0 : index
    %c0_137 = arith.constant 0 : index
    %311 = vector.load %arg8[%c1_135, %c0_136, %c0_137] : memref<2x1x32xf32, #tpu.memory_space<vmem>>, vector<1x1x32xf32>
    %312 = vector.shape_cast %311 : vector<1x1x32xf32> to vector<1x32xf32>
    %313 = vector.broadcast %312 : vector<1x32xf32> to vector<16x32xf32>
    %314 = arith.addf %310, %313 : vector<16x32xf32>
    %315 = arith.addf %314, %192 : vector<16x32xf32>
    %c1_138 = arith.constant 1 : index
    %c0_139 = arith.constant 0 : index
    %c0_140 = arith.constant 0 : index
    %316 = vector.load %arg9[%c1_138, %c0_139, %c0_140] : memref<2x1x32xf32, #tpu.memory_space<vmem>>, vector<1x1x32xf32>
    %317 = vector.shape_cast %316 : vector<1x1x32xf32> to vector<1x32xf32>
    %c1_141 = arith.constant 1 : index
    %c0_142 = arith.constant 0 : index
    %c0_143 = arith.constant 0 : index
    %318 = vector.load %arg10[%c1_141, %c0_142, %c0_143] : memref<2x1x32xf32, #tpu.memory_space<vmem>>, vector<1x1x32xf32>
    %319 = vector.shape_cast %318 : vector<1x1x32xf32> to vector<1x32xf32>
    %cst_144 = arith.constant dense<0.000000e+00> : vector<16xf32>
    %320 = vector.multi_reduction <add>, %315, %cst_144 [1] : vector<16x32xf32> to vector<16xf32>
    %321 = vector.shape_cast %320 : vector<16xf32> to vector<16x1xf32>
    %cst_145 = arith.constant 3.200000e+01 : f32
    %322 = vector.broadcast %cst_145 : f32 to vector<16x1xf32>
    %323 = arith.divf %321, %322 : vector<16x1xf32>
    %324 = vector.broadcast %323 : vector<16x1xf32> to vector<16x32xf32>
    %325 = arith.subf %315, %324 : vector<16x32xf32>
    %326 = arith.mulf %325, %325 : vector<16x32xf32>
    %cst_146 = arith.constant dense<0.000000e+00> : vector<16xf32>
    %327 = vector.multi_reduction <add>, %326, %cst_146 [1] : vector<16x32xf32> to vector<16xf32>
    %328 = vector.shape_cast %327 : vector<16xf32> to vector<16x1xf32>
    %cst_147 = arith.constant 3.200000e+01 : f32
    %329 = vector.broadcast %cst_147 : f32 to vector<16x1xf32>
    %330 = arith.divf %328, %329 : vector<16x1xf32>
    %331 = vector.broadcast %323 : vector<16x1xf32> to vector<16x32xf32>
    %332 = arith.subf %315, %331 : vector<16x32xf32>
    %cst_148 = arith.constant 9.99999974E-6 : f32
    %333 = vector.broadcast %cst_148 : f32 to vector<16x1xf32>
    %334 = arith.addf %330, %333 : vector<16x1xf32>
    %335 = math.rsqrt %334 : vector<16x1xf32>
    %336 = vector.broadcast %335 : vector<16x1xf32> to vector<16x32xf32>
    %337 = arith.mulf %332, %336 : vector<16x32xf32>
    %338 = vector.broadcast %317 : vector<1x32xf32> to vector<16x32xf32>
    %339 = arith.mulf %337, %338 : vector<16x32xf32>
    %340 = vector.broadcast %319 : vector<1x32xf32> to vector<16x32xf32>
    %341 = arith.addf %339, %340 : vector<16x32xf32>
    %c1_149 = arith.constant 1 : index
    %c0_150 = arith.constant 0 : index
    %c0_151 = arith.constant 0 : index
    %342 = vector.load %arg11[%c1_149, %c0_150, %c0_151] : memref<2x32x128xf32, #tpu.memory_space<vmem>>, vector<1x32x128xf32>
    %343 = vector.shape_cast %342 : vector<1x32x128xf32> to vector<32x128xf32>
    %cst_152 = arith.constant dense<0.000000e+00> : vector<16x128xf32>
    %344 = tpu.matmul %341, %343, %cst_152 {dimension_numbers = #tpu.dot_dimension_numbers<[1], [0], [0], [1], [0, 0, 1, 1], [], []>} : vector<16x32xf32>, vector<32x128xf32>, vector<16x128xf32> -> vector<16x128xf32>
    %c1_153 = arith.constant 1 : index
    %c0_154 = arith.constant 0 : index
    %c0_155 = arith.constant 0 : index
    %345 = vector.load %arg12[%c1_153, %c0_154, %c0_155] : memref<2x1x128xf32, #tpu.memory_space<vmem>>, vector<1x1x128xf32>
    %346 = vector.shape_cast %345 : vector<1x1x128xf32> to vector<1x128xf32>
    %347 = vector.broadcast %346 : vector<1x128xf32> to vector<16x128xf32>
    %348 = arith.addf %344, %347 : vector<16x128xf32>
    %cst_156 = arith.constant 0.000000e+00 : f32
    %349 = vector.broadcast %cst_156 : f32 to vector<16x128xf32>
    %350 = arith.maximumf %348, %349 : vector<16x128xf32>
    %c1_157 = arith.constant 1 : index
    %c0_158 = arith.constant 0 : index
    %c0_159 = arith.constant 0 : index
    %351 = vector.load %arg13[%c1_157, %c0_158, %c0_159] : memref<2x128x32xf32, #tpu.memory_space<vmem>>, vector<1x128x32xf32>
    %352 = vector.shape_cast %351 : vector<1x128x32xf32> to vector<128x32xf32>
    %cst_160 = arith.constant dense<0.000000e+00> : vector<16x32xf32>
    %353 = tpu.matmul %350, %352, %cst_160 {dimension_numbers = #tpu.dot_dimension_numbers<[1], [0], [0], [1], [0, 0, 1, 1], [], []>} : vector<16x128xf32>, vector<128x32xf32>, vector<16x32xf32> -> vector<16x32xf32>
    %c1_161 = arith.constant 1 : index
    %c0_162 = arith.constant 0 : index
    %c0_163 = arith.constant 0 : index
    %354 = vector.load %arg14[%c1_161, %c0_162, %c0_163] : memref<2x1x32xf32, #tpu.memory_space<vmem>>, vector<1x1x32xf32>
    %355 = vector.shape_cast %354 : vector<1x1x32xf32> to vector<1x32xf32>
    %356 = vector.broadcast %355 : vector<1x32xf32> to vector<16x32xf32>
    %357 = arith.addf %353, %356 : vector<16x32xf32>
    %358 = arith.addf %357, %341 : vector<16x32xf32>
    %c1_164 = arith.constant 1 : index
    %c0_165 = arith.constant 0 : index
    %c0_166 = arith.constant 0 : index
    %359 = vector.load %arg15[%c1_164, %c0_165, %c0_166] : memref<2x1x32xf32, #tpu.memory_space<vmem>>, vector<1x1x32xf32>
    %360 = vector.shape_cast %359 : vector<1x1x32xf32> to vector<1x32xf32>
    %c1_167 = arith.constant 1 : index
    %c0_168 = arith.constant 0 : index
    %c0_169 = arith.constant 0 : index
    %361 = vector.load %arg16[%c1_167, %c0_168, %c0_169] : memref<2x1x32xf32, #tpu.memory_space<vmem>>, vector<1x1x32xf32>
    %362 = vector.shape_cast %361 : vector<1x1x32xf32> to vector<1x32xf32>
    %cst_170 = arith.constant dense<0.000000e+00> : vector<16xf32>
    %363 = vector.multi_reduction <add>, %358, %cst_170 [1] : vector<16x32xf32> to vector<16xf32>
    %364 = vector.shape_cast %363 : vector<16xf32> to vector<16x1xf32>
    %cst_171 = arith.constant 3.200000e+01 : f32
    %365 = vector.broadcast %cst_171 : f32 to vector<16x1xf32>
    %366 = arith.divf %364, %365 : vector<16x1xf32>
    %367 = vector.broadcast %366 : vector<16x1xf32> to vector<16x32xf32>
    %368 = arith.subf %358, %367 : vector<16x32xf32>
    %369 = arith.mulf %368, %368 : vector<16x32xf32>
    %cst_172 = arith.constant dense<0.000000e+00> : vector<16xf32>
    %370 = vector.multi_reduction <add>, %369, %cst_172 [1] : vector<16x32xf32> to vector<16xf32>
    %371 = vector.shape_cast %370 : vector<16xf32> to vector<16x1xf32>
    %cst_173 = arith.constant 3.200000e+01 : f32
    %372 = vector.broadcast %cst_173 : f32 to vector<16x1xf32>
    %373 = arith.divf %371, %372 : vector<16x1xf32>
    %374 = vector.broadcast %366 : vector<16x1xf32> to vector<16x32xf32>
    %375 = arith.subf %358, %374 : vector<16x32xf32>
    %cst_174 = arith.constant 9.99999974E-6 : f32
    %376 = vector.broadcast %cst_174 : f32 to vector<16x1xf32>
    %377 = arith.addf %373, %376 : vector<16x1xf32>
    %378 = math.rsqrt %377 : vector<16x1xf32>
    %379 = vector.broadcast %378 : vector<16x1xf32> to vector<16x32xf32>
    %380 = arith.mulf %375, %379 : vector<16x32xf32>
    %381 = vector.broadcast %360 : vector<1x32xf32> to vector<16x32xf32>
    %382 = arith.mulf %380, %381 : vector<16x32xf32>
    %383 = vector.broadcast %362 : vector<1x32xf32> to vector<16x32xf32>
    %384 = arith.addf %382, %383 : vector<16x32xf32>
    %c0_175 = arith.constant 0 : index
    %c0_176 = arith.constant 0 : index
    %385 = vector.load %arg17[%c0_175, %c0_176] : memref<1x32xf32, #tpu.memory_space<vmem>>, vector<1x32xf32>
    %c0_177 = arith.constant 0 : index
    %c0_178 = arith.constant 0 : index
    %386 = vector.load %arg18[%c0_177, %c0_178] : memref<1x32xf32, #tpu.memory_space<vmem>>, vector<1x32xf32>
    %cst_179 = arith.constant dense<0.000000e+00> : vector<16xf32>
    %387 = vector.multi_reduction <add>, %384, %cst_179 [1] : vector<16x32xf32> to vector<16xf32>
    %388 = vector.shape_cast %387 : vector<16xf32> to vector<16x1xf32>
    %cst_180 = arith.constant 3.200000e+01 : f32
    %389 = vector.broadcast %cst_180 : f32 to vector<16x1xf32>
    %390 = arith.divf %388, %389 : vector<16x1xf32>
    %391 = vector.broadcast %390 : vector<16x1xf32> to vector<16x32xf32>
    %392 = arith.subf %384, %391 : vector<16x32xf32>
    %393 = arith.mulf %392, %392 : vector<16x32xf32>
    %cst_181 = arith.constant dense<0.000000e+00> : vector<16xf32>
    %394 = vector.multi_reduction <add>, %393, %cst_181 [1] : vector<16x32xf32> to vector<16xf32>
    %395 = vector.shape_cast %394 : vector<16xf32> to vector<16x1xf32>
    %cst_182 = arith.constant 3.200000e+01 : f32
    %396 = vector.broadcast %cst_182 : f32 to vector<16x1xf32>
    %397 = arith.divf %395, %396 : vector<16x1xf32>
    %398 = vector.broadcast %390 : vector<16x1xf32> to vector<16x32xf32>
    %399 = arith.subf %384, %398 : vector<16x32xf32>
    %cst_183 = arith.constant 9.99999974E-6 : f32
    %400 = vector.broadcast %cst_183 : f32 to vector<16x1xf32>
    %401 = arith.addf %397, %400 : vector<16x1xf32>
    %402 = math.rsqrt %401 : vector<16x1xf32>
    %403 = vector.broadcast %402 : vector<16x1xf32> to vector<16x32xf32>
    %404 = arith.mulf %399, %403 : vector<16x32xf32>
    %405 = vector.broadcast %385 : vector<1x32xf32> to vector<16x32xf32>
    %406 = arith.mulf %404, %405 : vector<16x32xf32>
    %407 = vector.broadcast %386 : vector<1x32xf32> to vector<16x32xf32>
    %408 = arith.addf %406, %407 : vector<16x32xf32>
    %c0_184 = arith.constant 0 : index
    %c0_185 = arith.constant 0 : index
    %409 = vector.load %arg19[%c0_184, %c0_185] : memref<16x32xf32, #tpu.memory_space<vmem>>, vector<16x32xf32>
    tpu.vector_store %arg19[%c0_184, %c0_185], %408 {strides = array<i32>} : memref<16x32xf32, #tpu.memory_space<vmem>>, vector<16x32xf32>,
    return
  }
}

</mosaic_0001>

<bundles_post_ra>
// kernel: tpu_custom_call.1
= control target key start
LH: loop header
LB: loop body
LE: loop exit
PB: predicated region body
PF: predicated region fallthrough
CT: control target
= control target key end

     0   :  { %s6348_s0 = inlined_call_operand.hbm [shape: f32[16,32], index: 0, kind: input, shape index: {}]   ;;  %s6349_s1 = inlined_call_operand.vmem [shape: f32[2,32,32], index: 1, kind: input, shape index: {}]   ;;  %s6350_s2 = inlined_call_operand.vmem [shape: f32[2,1,32], index: 2, kind: input, shape index: {}]   ;;  %s6351_s3 = inlined_call_operand.vmem [shape: f32[2,32,32], index: 3, kind: input, shape index: {}]   ;;  %s6352_s4 = inlined_call_operand.vmem [shape: f32[2,1,32], index: 4, kind: input, shape index: {}]   ;;  %s6353_s5 = inlined_call_operand.vmem [shape: f32[2,32,32], index: 5, kind: input, shape index: {}]   ;;  %s6354_s6 = inlined_call_operand.vmem [shape: f32[2,1,32], index: 6, kind: input, shape index: {}]   ;;  %s6355_s7 = inlined_call_operand.vmem [shape: f32[2,32,32], index: 7, kind: input, shape index: {}]   ;;  %s6356_s8 = inlined_call_operand.vmem [shape: f32[2,1,32], index: 8, kind: input, shape index: {}]   ;;  %s6357_s9 = inlined_call_operand.vmem [shape: f32[2,1,32], index: 9, kind: input, shape index: {}]   ;;  %s6358_s10 = inlined_call_operand.vmem [shape: f32[2,1,32], index: 10, kind: input, shape index: {}]   ;;  %s6359_s11 = inlined_call_operand.vmem [shape: f32[2,32,128], index: 11, kind: input, shape index: {}]   ;;  %s6360_s12 = inlined_call_operand.vmem [shape: f32[2,1,128], index: 12, kind: input, shape index: {}]   ;;  %s6361_s13 = inlined_call_operand.vmem [shape: f32[2,128,32], index: 13, kind: input, shape index: {}]   ;;  %s6362_s14 = inlined_call_operand.vmem [shape: f32[2,1,32], index: 14, kind: input, shape index: {}]   ;;  %s6363_s15 = inlined_call_operand.vmem [shape: f32[2,1,32], index: 15, kind: input, shape index: {}]   ;;  %s6364_s16 = inlined_call_operand.vmem [shape: f32[2,1,32], index: 16, kind: input, shape index: {}]   ;;  %s6365_s17 = inlined_call_operand.vmem [shape: f32[1,32], index: 17, kind: input, shape index: {}]   ;;  %s6366_s18 = inlined_call_operand.vmem [shape: f32[1,32], index: 18, kind: input, shape index: {}]   ;;  %s6367_s19 = inlined_call_operand.hbm [shape: f32[16,32], index: 19, kind: output, shape index: {}]  }
   0x1   :  { %6376 = sst [smem:[#allocation8_spill]] %s6348_s0 }
   0x2   :  { %6377 = sst [smem:[#allocation9_spill]] %s6349_s1 }
   0x3   :  { %6378 = sst [smem:[#allocation10_spill]] %s6350_s2 }
   0x4   :  { %6379 = sst [smem:[#allocation11_spill]] %s6351_s3 }
   0x5   :  { %24 = vsyncpa [#allocation3], 0 }
   0x6   :  { %25 = vsyncpa [#allocation4], 0  ;;  %s5538_s0 = smov [#allocation2]   ;;  %s6380_s1 = sld [smem:[#allocation8_spill]] }
   0x7   :  { %s31_s30 = sshll.u32 %s5538_s0, 4  ;;  %s32_s30 = int_to_ptr.vmem [resolvable:$true] %s31_s30 }
   0xc   :  { %s5490_s22 = scalar_lea.hbm %s6380_s1, 256 }
   0xd   :  { %p5491_p0 = scmp.ne.s32.totalorder %s6380_s1, %s5490_s22  ;;  %p5494_p1 = scmp.lt.u32.totalorder %s5490_s22, %s6380_s1 }
   0xf   :  { %p5496_p2 = pnand %p5494_p1, %p5491_p0 }
  0x11   :  { %5499 = shalt.err (!%p5496_p2)
}
  0x12   :  { %s5500_s3 = scalar_lea.vmem %s32_s30, 256  ;;  %p5505_p4 = scmp.lt.s32.totalorder %s32_s30, %s32_s30 }
  0x13   :  { %p5501_p3 = scmp.ne.s32.totalorder %s32_s30, %s5500_s3  ;;  %p5506_p5 = scmp.lt.s32.totalorder %s5500_s3, %s5500_s3 }
  0x15   :  { %p5507_p6 = por %p5506_p5, %p5505_p4 }
  0x17   :  { %p5508_p7 = pnand %p5507_p6, %p5501_p3 }
  0x19   :  { %5511 = shalt.err (!%p5508_p7)
}
  0x1a   :  { %s6372_s26 = smov 128   ;;  %s6373_s27 = smov 8  }
  0x1b   :  { %37 = dma.hbm_to_vmem [thread:$0]  %s6380_s1, 256, %s32_s30, [#allocation3], %s6372_s26, %s6372_s26, %s6373_s27  }
  0x1c   :  { %5534 = dma.done.wait [#allocation3], 256  }
  0x1d   :  { %5535 = vsyncadd [#allocation3], 4294967040  ;;  %vm90_vm0 = vcmask 261120   ;;  %s6381_s21 = sld [smem:[#allocation9_spill]]  ;;  %v5674_v5 = vld [vmem:[#allocation2] sm:$0xff]  ;;  %s6382_s28 = sld [smem:[#allocation11_spill]] }
  0x1e   :  { %4907 = vmatprep.mubr.msk.f32.mxu1 %vm90_vm0, %v5674_v5  ;;  %v5690_v12 = vld [vmem:[#allocation2 + $0x8] sm:$0xff]  ;;  %v258_v14 = vld [vmem:[%s6353_s5] sm:$0xff]  ;;  %v260_v17 = vld [vmem:[%s6353_s5 + $0x10] sm:$0xff]  ;;  %v5541_v20 = vmov 0.0   ;;  %vm5542_vm1 = vmmov 0   ;;  %vm348_vm2 = vcmask 64512  }
  0x1f   :  { %v259_v15 = vld [vmem:[%s6353_s5 + $0x8] sm:$0xff]  ;;  %v261_v18 = vld [vmem:[%s6353_s5 + $0x18] sm:$0xff]  ;;  %4942 = vmatprep.subr.mxu0 %v5541_v20  ;;  %4944 = vmatprep.mubr.msk.f32.mxu0 %vm5542_vm1, %v5541_v20  ;;  %v4582_v23 = vld [vmem:[%s6352_s4] ss:$0 sm:$0xff]  ;;  %s6383_s25 = sld [smem:[#allocation10_spill]]  ;;  %s5543_s3 = smov 120  }
  0x20   :  { %v5273_v16 = vpack.c.bf16 %v259_v15, %v258_v14  ;;  %v5277_v19 = vpack.c.bf16 %v261_v18, %v260_v17  ;;  %v4585_v31 = vld [vmem:[%s6354_s6] ss:$0 sm:$0xff]  ;;  %s5544_s29 = smov 112   ;;  %s6374_s23 = smov 104  }
  0x21   :  { %s5546_s26 = smov [#allocation5]  }
  0x22   :  { %s4567_s22 = sshll.u32 %s5546_s26, 4  ;;  %s4568_s22 = int_to_ptr.vmem [resolvable:$true] %s4567_s22 }
  0x23   :  { %v79_v0 = vld [vmem:[%s6381_s21] sm:$0xff]  ;;  %v80_v1 = vld [vmem:[%s6381_s21 + $0x8] sm:$0xff]  ;;  %v81_v2 = vld [vmem:[%s6381_s21 + $0x10] sm:$0xff]  ;;  %p5517_p9 = scmp.lt.s32.totalorder %s4568_s22, %s4568_s22 }
  0x24   :  { %v5257_v3 = vpack.c.bf16 %v80_v1, %v79_v0  ;;  %v82_v4 = vld [vmem:[%s6381_s21 + $0x18] sm:$0xff]  ;;  %v172_v7 = vld [vmem:[%s6382_s28] sm:$0xff]  ;;  %v173_v8 = vld [vmem:[%s6382_s28 + $0x8] sm:$0xff] }
  0x25   :  { %v5261_v6 = vpack.c.bf16 %v82_v4, %v81_v2  ;;  %v5265_v9 = vpack.c.bf16 %v173_v8, %v172_v7  ;;  %v174_v10 = vld [vmem:[%s6382_s28 + $0x10] sm:$0xff]  ;;  %v175_v11 = vld [vmem:[%s6382_s28 + $0x18] sm:$0xff]  ;;  %v4579_v27 = vld [vmem:[%s6383_s25] ss:$0 sm:$0xff] }
  0x26   :  { %5258 = vmatprep.subr.bf16.mxu1 %v5257_v3  ;;  %v5269_v13 = vpack.c.bf16 %v175_v11, %v174_v10 }
  0x27   :  { %5260 = vmatpush3.bf16.msra.mxu1 %v5257_v3 }
  0x28   :  { %5262 = vmatprep.subr.bf16.mxu1 %v5261_v6 }
  0x2b   :  { %5264 = vmatpush3.bf16.msra.mxu1 %v5261_v6 }
  0x2c   :  { %5266 = vmatprep.subr.bf16.mxu1 %v5265_v9 }
  0x2e   :  { %4908 = vmatmul.mubr.msk.f32.vlgmr.msra.gmra.mrb[0].mxu1 %vm90_vm0, %v5690_v12 }
  0x2f   :  { %5268 = vmatpush3.bf16.msra.mxu1 %v5265_v9  ;;  %4918 = vmatprep.mubr.msk.f32.mxu1 %vm90_vm0, %v5674_v5 }
  0x30   :  { %5270 = vmatprep.subr.bf16.mxu1 %v5269_v13 }
  0x33   :  { %5272 = vmatpush3.bf16.msra.mxu1 %v5269_v13 }
  0x34   :  { %5274 = vmatprep.subr.bf16.mxu1 %v5273_v16 }
  0x36   :  { %4919 = vmatmul.mubr.msk.f32.vlgmr.msra.gmra.mrb[2].mxu1 %vm90_vm0, %v5690_v12 }
  0x37   :  { %5276 = vmatpush3.bf16.msra.mxu1 %v5273_v16  ;;  %4929 = vmatprep.mubr.msk.f32.mxu1 %vm90_vm0, %v5674_v5 }
  0x38   :  { %5278 = vmatprep.subr.bf16.mxu1 %v5277_v19 }
  0x3b   :  { %5280 = vmatpush3.bf16.msra.mxu1 %v5277_v19 }
  0x3c   :  { %4932 = vmatprep.subr.mxu1 %v5541_v20 }
  0x3e   :  { %4930 = vmatmul.mubr.msk.f32.vlgmr.msra.gmra.mrb[4].mxu1 %vm90_vm0, %v5690_v12 }
  0x3f   :  { %4934 = vmatprep.mubr.msk.f32.mxu1 %vm5542_vm1, %v5541_v20 }
 0x101   :  { %v4909_v21 = vpop.f32.mrb[0].mxu1 }
 0x102   :  { %v163_v22 = vpop.f32.mrb[1].mxu1  ;;  %v5734_v29 = vadd.f32 %v4909_v21, %v4579_v27 }
 0x103   :  { %v5736_v30 = vadd.f32 %v4579_v27, %v163_v22 }
 0x109   :  { %v4920_v24 = vpop.f32.mrb[2].mxu1 }
 0x10a   :  { %v5723_v25 = vadd.f32 %v4920_v24, %v4582_v23  ;;  %v249_v26 = vpop.f32.mrb[3].mxu1 }
 0x10b   :  { %v5728_v28 = vadd.f32 %v4582_v23, %v249_v26 }
 0x10c   :  { %751 = vrot.lane.b32.xlu1 %v5723_v25, %s5543_s3 }
 0x10d   :  { %4933 = vmatpush3.xpose.msk.msra.mxu1 %vm348_vm2, %v5728_v28 }
 0x10e   :  { %4937 = vmatprep.subr.mxu1 %v5541_v20 }
 0x110   :  { %749 = vrot.lane.b32.xlu1 %v5734_v29, %s5543_s3  ;;  %4935 = vmatmul.mubr.msk.f32.vlgmr.msra.gmra.mrb[6].mxu1 %vm348_vm2, %v5736_v30 }
 0x111   :  { %4938 = vmatpush3.xpose.msk.msra.mxu1 %vm348_vm2, %v5723_v25  ;;  %4939 = vmatprep.mubr.msk.f32.mxu1 %vm5542_vm1, %v5541_v20  ;;  %v4931_v32 = vpop.f32.mrb[4].mxu1 }
 0x112   :  { %4947 = vmatprep.subr.mxu1 %v5541_v20  ;;  %v5755_v33 = vadd.f32 %v4931_v32, %v4585_v31  ;;  %v335_v34 = vpop.f32.mrb[5].mxu1 }
 0x113   :  { %v5757_v35 = vadd.f32 %v4585_v31, %v335_v34 }
 0x114   :  { %4940 = vmatmul.mubr.msk.f32.vlgmr.msra.gmra.mrb[8].mxu1 %vm348_vm2, %v5734_v29 }
 0x115   :  { %4949 = vmatprep.mubr.msk.f32.mxu1 %vm5542_vm1, %v5541_v20  ;;  %4948 = vmatpush3.msra.mxu1 %v5755_v33 }
 0x116   :  { %4943 = vmatpush3.msra.mxu0 %v5757_v35  ;;  %4957 = vmatprep.subr.mxu1 %v5541_v20 }
 0x117   :  { %4952 = vmatprep.subr.mxu0 %v5541_v20 }
 0x17e   :  { %v752_v54 = vpop.permute.xlu1 %751 }
 0x182   :  { %v750_v56 = vpop.permute.xlu1 %749 }
 0x1e3   :  { %v421_v36 = vpop.f32.mrb[6].mxu1 }
 0x1e4   :  { %v4936_v37 = vpop.f32.mrb[7].mxu1  ;;  %v501_v46 = vmul.f32 0.17677669, %v421_v36 }
 0x1e6   :  { %v503_v48 = vsel %vm348_vm2, %v501_v46, -inf }
 0x1e7   :  { %v497_v38 = vpop.f32.mrb[8].mxu1 }
 0x1e8   :  { %v502_v39 = vmul.f32 0.17677669, %v497_v38  ;;  %v4941_v40 = vpop.f32.mrb[9].mxu1 }
 0x1ea   :  { %v506_v41 = vsel %vm348_vm2, %v502_v39, -inf }
 0x1eb   :  { %507 = vmax.xlane.f32.xlu0 %v506_v41 }
 0x278   :  { %v508_v42 = vpop.xlane.xlu0 %507 }
 0x279   :  { %v510_v43 = vsub.f32 %v502_v39, %v508_v42 }
 0x27b   :  { %v513_v44 = vmul.f32 1.442695, %v510_v43 }
 0x27d   :  { %5406 = vpow2.f32 %v513_v44 }
 0x287   :  { %v5407_v45 = vpop.eup %5406 }
 0x288   :  { %v518_v47 = vsel %vm348_vm2, %v5407_v45, 0.0 }
 0x289   :  { %519 = vadd.xlane.f32.xlu0 %v518_v47 }
 0x28d   :  { %504 = vmax.xlane.f32.xlu0 %v503_v48 }
 0x2a3   :  { %673 = vrot.lane.b32.xlu0 %v5728_v28, %s5543_s3 }
 0x2a7   :  { %671 = vrot.lane.b32.xlu0 %v5736_v30, %s5543_s3 }
 0x316   :  { %v520_v49 = vpop.xlane.xlu0 %519 }
 0x317   :  { %5408 = vrcp.f32 %v520_v49 }
 0x31a   :  { %v505_v50 = vpop.xlane.xlu0 %504 }
 0x31b   :  { %v509_v51 = vsub.f32 %v501_v46, %v505_v50 }
 0x31d   :  { %v511_v52 = vmul.f32 1.442695, %v509_v51 }
 0x31e   :  { %v674_v62 = vpop.permute.xlu0 %673 }
 0x31f   :  { %5410 = vpow2.f32 %v511_v52 }
 0x321   :  { %v5409_v53 = vpop.eup %5408 }
 0x322   :  { %v524_v55 = vmul.f32 %v5409_v53, %v5407_v45  ;;  %v672_v0 = vpop.permute.xlu0 %671  ;;  %v345_v53 = vld [vmem:[%s6355_s7 + $0x8] sm:$0xff] }
 0x324   :  { %4950 = vmatmul.mubr.msk.f32.vlgmr.msra.gmra.mrb[10].mxu1 %vm348_vm2, %v524_v55 }
 0x325   :  { %4958 = vmatpush3.xpose.msk.msra.mxu1 %vm348_vm2, %v752_v54  ;;  %4959 = vmatprep.mubr.msk.f32.mxu1 %vm5542_vm1, %v5541_v20  ;;  %v344_v54 = vld [vmem:[%s6355_s7] sm:$0xff] }
 0x326   :  { %4967 = vmatprep.subr.mxu1 %v5541_v20 }
 0x328   :  { %4960 = vmatmul.mubr.msk.f32.vlgmr.msra.gmra.mrb[12].mxu1 %vm348_vm2, %v750_v56 }
 0x329   :  { %v5411_v57 = vpop.eup %5410  ;;  %4969 = vmatprep.mubr.msk.f32.mxu1 %vm5542_vm1, %v5541_v20 }
 0x32a   :  { %v515_v58 = vsel %vm348_vm2, %v5411_v57, 0.0 }
 0x32b   :  { %516 = vadd.xlane.f32.xlu1 %v515_v58 }
 0x33c   :  { %929 = vrot.lane.b32.xlu1 %v5755_v33, %s5543_s3 }
 0x340   :  { %1169 = vrot.lane.b32.xlu1 %v5728_v28, %s5544_s29 }
 0x344   :  { %1247 = vrot.lane.b32.xlu1 %v5723_v25, %s5544_s29 }
 0x3b8   :  { %v517_v59 = vpop.xlane.xlu1 %516 }
 0x3b9   :  { %5412 = vrcp.f32 %v517_v59 }
 0x3bc   :  { %v930_v60 = vpop.permute.xlu1 %929 }
 0x3bd   :  { %4968 = vmatpush3.msra.mxu1 %v930_v60 }
 0x3be   :  { %4982 = vmatprep.subr.mxu1 %v5541_v20 }
 0x3c0   :  { %v1170_v21 = vpop.permute.xlu1 %1169 }
 0x3c3   :  { %v5413_v61 = vpop.eup %5412 }
 0x3c4   :  { %v523_v63 = vmul.f32 %v5413_v61, %v5411_v57  ;;  %v1248_v22 = vpop.permute.xlu1 %1247 }
 0x3c6   :  { %4945 = vmatmul.mubr.msk.f32.vlgmr.msra.gmra.mrb[0].mxu0 %vm348_vm2, %v523_v63 }
 0x3c7   :  { %4953 = vmatpush3.xpose.msk.msra.mxu0 %vm348_vm2, %v674_v62  ;;  %4954 = vmatprep.mubr.msk.f32.mxu0 %vm5542_vm1, %v5541_v20 }
 0x3c8   :  { %4962 = vmatprep.subr.mxu0 %v5541_v20 }
 0x3ca   :  { %4955 = vmatmul.mubr.msk.f32.vlgmr.msra.gmra.mrb[2].mxu0 %vm348_vm2, %v672_v0 }
 0x3cb   :  { %4964 = vmatprep.mubr.msk.f32.mxu0 %vm5542_vm1, %v5541_v20 }
 0x3f7   :  { %v5794_v1 = vpop.f32.mrb[10].mxu1 }
 0x3f8   :  { %v4951_v2 = vpop.f32.mrb[11].mxu1 }
 0x3fb   :  { %v823_v3 = vpop.f32.mrb[12].mxu1 }
 0x3fc   :  { %v828_v4 = vmul.f32 0.17677669, %v823_v3  ;;  %v4961_v6 = vpop.f32.mrb[13].mxu1 }
 0x3fe   :  { %v832_v7 = vsel %vm348_vm2, %v828_v4, -inf }
 0x3ff   :  { %833 = vmax.xlane.f32.xlu0 %v832_v7 }
 0x415   :  { %1167 = vrot.lane.b32.xlu0 %v5736_v30, %s5544_s29 }
 0x48c   :  { %v834_v8 = vpop.xlane.xlu0 %833 }
 0x48d   :  { %v836_v9 = vsub.f32 %v828_v4, %v834_v8 }
 0x48f   :  { %v839_v10 = vmul.f32 1.442695, %v836_v9 }
 0x490   :  { %v1168_v27 = vpop.permute.xlu0 %1167 }
 0x491   :  { %5414 = vpow2.f32 %v839_v10 }
 0x499   :  { %v5799_v11 = vpop.f32.mrb[0].mxu0 }
 0x49a   :  { %v4946_v13 = vpop.f32.mrb[1].mxu0 }
 0x49b   :  { %v5415_v14 = vpop.eup %5414 }
 0x49c   :  { %v844_v15 = vsel %vm348_vm2, %v5415_v14, 0.0 }
 0x49d   :  { %v745_v16 = vpop.f32.mrb[2].mxu0  ;;  %845 = vadd.xlane.f32.xlu1 %v844_v15 }
 0x49e   :  { %v4956_v17 = vpop.f32.mrb[3].mxu0  ;;  %v827_v18 = vmul.f32 0.17677669, %v745_v16 }
 0x4a0   :  { %v829_v19 = vsel %vm348_vm2, %v827_v18, -inf }
 0x4ae   :  { %1245 = vrot.lane.b32.xlu1 %v5734_v29, %s5544_s29 }
 0x4d2   :  { %830 = vmax.xlane.f32.xlu1 %v829_v19 }
 0x4e3   :  { %852 = vrot.lane.b32.xlu1 %v5757_v35, %s5543_s3 }
 0x52a   :  { %v846_v23 = vpop.xlane.xlu1 %845 }
 0x52b   :  { %5416 = vrcp.f32 %v846_v23 }
 0x52e   :  { %v1246_v31 = vpop.permute.xlu1 %1245 }
 0x535   :  { %v5417_v24 = vpop.eup %5416 }
 0x536   :  { %v850_v26 = vmul.f32 %v5417_v24, %v5415_v14 }
 0x538   :  { %4970 = vmatmul.mubr.msk.f32.vlgmr.msra.gmra.mrb[14].mxu1 %vm348_vm2, %v850_v26 }
 0x539   :  { %4983 = vmatpush3.xpose.msk.msra.mxu1 %vm348_vm2, %v1170_v21  ;;  %4984 = vmatprep.mubr.msk.f32.mxu1 %vm5542_vm1, %v5541_v20 }
 0x53a   :  { %4987 = vmatprep.subr.mxu1 %v5541_v20 }
 0x53c   :  { %4985 = vmatmul.mubr.msk.f32.vlgmr.msra.gmra.mrb[16].mxu1 %vm348_vm2, %v1168_v27 }
 0x53d   :  { %4988 = vmatpush3.xpose.msk.msra.mxu1 %vm348_vm2, %v1248_v22  ;;  %4989 = vmatprep.mubr.msk.f32.mxu1 %vm5542_vm1, %v5541_v20 }
 0x53e   :  { %4997 = vmatprep.subr.mxu1 %v5541_v20 }
 0x540   :  { %4990 = vmatmul.mubr.msk.f32.vlgmr.msra.gmra.mrb[18].mxu1 %vm348_vm2, %v1246_v31 }
 0x541   :  { %4999 = vmatprep.mubr.msk.f32.mxu1 %vm5542_vm1, %v5541_v20 }
 0x55f   :  { %v831_v32 = vpop.xlane.xlu1 %830 }
 0x560   :  { %v835_v34 = vsub.f32 %v827_v18, %v831_v32 }
 0x562   :  { %v837_v36 = vmul.f32 1.442695, %v835_v34 }
 0x563   :  { %v853_v37 = vpop.permute.xlu1 %852 }
 0x564   :  { %5418 = vpow2.f32 %v837_v36  ;;  %4963 = vmatpush3.msra.mxu0 %v853_v37 }
 0x565   :  { %4972 = vmatprep.subr.mxu0 %v345_v53 }
 0x56e   :  { %v5419_v38 = vpop.eup %5418 }
 0x56f   :  { %v841_v39 = vsel %vm348_vm2, %v5419_v38, 0.0 }
 0x570   :  { %842 = vadd.xlane.f32.xlu0 %v841_v39 }
 0x5fd   :  { %v843_v40 = vpop.xlane.xlu0 %842 }
 0x5fe   :  { %5420 = vrcp.f32 %v843_v40 }
 0x608   :  { %v5421_v41 = vpop.eup %5420 }
 0x609   :  { %v849_v42 = vmul.f32 %v5421_v41, %v5419_v38 }
 0x60b   :  { %4965 = vmatmul.mubr.msk.f32.vlgmr.msra.gmra.mrb[4].mxu0 %vm348_vm2, %v849_v42  ;;  %v1001_v43 = vpop.f32.mrb[14].mxu1 }
 0x60c   :  { %v4971_v44 = vpop.f32.mrb[15].mxu1  ;;  %4973 = vmatpush3.msra.mxu0 %v345_v53 }
 0x60d   :  { %4977 = vmatprep.subr.mxu0 %v344_v54 }
 0x60f   :  { %v1241_v45 = vpop.f32.mrb[16].mxu1 }
 0x610   :  { %v1323_v46 = vmul.f32 0.17677669, %v1241_v45  ;;  %v4986_v47 = vpop.f32.mrb[17].mxu1 }
 0x612   :  { %v1325_v48 = vsel %vm348_vm2, %v1323_v46, -inf }
 0x613   :  { %1326 = vmax.xlane.f32.xlu0 %v1325_v48  ;;  %v1319_v49 = vpop.f32.mrb[18].mxu1 }
 0x614   :  { %v1324_v50 = vmul.f32 0.17677669, %v1319_v49  ;;  %v4991_v51 = vpop.f32.mrb[19].mxu1 }
 0x616   :  { %v1328_v52 = vsel %vm348_vm2, %v1324_v50, -inf }
 0x617   :  { %1329 = vmax.xlane.f32.xlu0 %v1328_v52 }
 0x6a0   :  { %v1327_v55 = vpop.xlane.xlu0 %1326 }
 0x6a1   :  { %v1331_v56 = vsub.f32 %v1323_v46, %v1327_v55 }
 0x6a3   :  { %v1333_v57 = vmul.f32 1.442695, %v1331_v56 }
 0x6a4   :  { %v1330_v58 = vpop.xlane.xlu0 %1329 }
 0x6a5   :  { %5422 = vpow2.f32 %v1333_v57  ;;  %v1332_v59 = vsub.f32 %v1324_v50, %v1330_v58  ;;  %v347_v50 = vld [vmem:[%s6355_s7 + $0x18] sm:$0xff] }
 0x6a7   :  { %v1335_v60 = vmul.f32 1.442695, %v1332_v59 }
 0x6a9   :  { %5424 = vpow2.f32 %v1335_v60 }
 0x6af   :  { %v5423_v61 = vpop.eup %5422 }
 0x6b0   :  { %v1337_v62 = vsel %vm348_vm2, %v5423_v61, 0.0 }
 0x6b1   :  { %1338 = vadd.xlane.f32.xlu0 %v1337_v62 }
 0x6b3   :  { %v5425_v63 = vpop.eup %5424 }
 0x6b4   :  { %v1340_v0 = vsel %vm348_vm2, %v5425_v63, 0.0 }
 0x6b5   :  { %1341 = vadd.xlane.f32.xlu1 %v1340_v0 }
 0x6c6   :  { %1582 = vrot.lane.b32.xlu1 %v5736_v30, %s6374_s23 }
 0x6c7   :  { %1347 = vrot.lane.b32.xlu0 %v5757_v35, %s5544_s29 }
 0x6cb   :  { %1423 = vrot.lane.b32.xlu0 %v5755_v33, %s5544_s29 }
 0x6cf   :  { %1584 = vrot.lane.b32.xlu0 %v5728_v28, %s6374_s23  ;;  %v346_v28 = vld [vmem:[%s6355_s7 + $0x10] sm:$0xff] }
 0x6d3   :  { %1662 = vrot.lane.b32.xlu0 %v5723_v25, %s6374_s23 }
 0x6d7   :  { %1660 = vrot.lane.b32.xlu0 %v5734_v29, %s6374_s23 }
 0x6de   :  { %v924_v2 = vpop.f32.mrb[4].mxu0 }
 0x6df   :  { %v4966_v3 = vpop.f32.mrb[5].mxu0  ;;  %4974 = vmatprep.mubr.msk.f32.mxu0 %vm348_vm2, %v924_v2 }
 0x6e0   :  { %4975 = vmatmul.mubr.msk.f32.vlgmr.msra.gmra.mrb[6].mxu0 %vm348_vm2, %v1001_v43 }
 0x6e1   :  { %4979 = vmatprep.mubr.msk.f32.mxu0 %vm348_vm2, %v5799_v11  ;;  %4978 = vmatpush3.msra.mxu0 %v344_v54  ;;  %v4620_v54 = vld [vmem:[%s6356_s8] ss:$0 sm:$0xff] }
 0x6e2   :  { %4992 = vmatprep.subr.mxu0 %v5541_v20 }
 0x6e8   :  { %4980 = vmatmul.mubr.msk.f32.vlgmr.msra.gmra.mrb[6].mxu0 %vm348_vm2, %v5794_v1 }
 0x6e9   :  { %4994 = vmatprep.mubr.msk.f32.mxu0 %vm5542_vm1, %v5541_v20 }
 0x73e   :  { %v1339_v25 = vpop.xlane.xlu0 %1338 }
 0x73f   :  { %5426 = vrcp.f32 %v1339_v25 }
 0x742   :  { %v1342_v29 = vpop.xlane.xlu1 %1341  ;;  %v1348_v30 = vpop.permute.xlu0 %1347 }
 0x743   :  { %5428 = vrcp.f32 %v1342_v29  ;;  %4993 = vmatpush3.msra.mxu0 %v1348_v30 }
 0x744   :  { %5002 = vmatprep.subr.mxu0 %v346_v28 }
 0x746   :  { %v1424_v4 = vpop.permute.xlu0 %1423  ;;  %v1583_v10 = vpop.permute.xlu1 %1582 }
 0x747   :  { %4998 = vmatpush3.msra.mxu1 %v1424_v4  ;;  %v2053_v4 = vld [vmem:[%s6359_s11] sm:$0xff] }
 0x748   :  { %5007 = vmatprep.subr.mxu1 %v5541_v20 }
 0x749   :  { %v5427_v6 = vpop.eup %5426 }
 0x74a   :  { %v1345_v1 = vmul.f32 %v5427_v6, %v5423_v61  ;;  %v1585_v9 = vpop.permute.xlu0 %1584  ;;  %v2054_v6 = vld [vmem:[%s6359_s11 + $0x8] sm:$0xff] }
 0x74c   :  { %4995 = vmatmul.mubr.msk.f32.vlgmr.msra.gmra.mrb[8].mxu0 %vm348_vm2, %v1345_v1  ;;  %v5281_v1 = vpack.c.bf16 %v2054_v6, %v2053_v4 }
 0x74d   :  { %v5429_v7 = vpop.eup %5428  ;;  %5003 = vmatpush3.msra.mxu0 %v346_v28 }
 0x74e   :  { %v1346_v8 = vmul.f32 %v5429_v7, %v5425_v63  ;;  %5012 = vmatprep.subr.mxu0 %v5541_v20  ;;  %v1663_v14 = vpop.permute.xlu0 %1662  ;;  %v2055_v7 = vld [vmem:[%s6359_s11 + $0x10] sm:$0xff] }
 0x750   :  { %5000 = vmatmul.mubr.msk.f32.vlgmr.msra.gmra.mrb[20].mxu1 %vm348_vm2, %v1346_v8  ;;  %v2056_v8 = vld [vmem:[%s6359_s11 + $0x18] sm:$0xff] }
 0x751   :  { %5008 = vmatpush3.xpose.msk.msra.mxu1 %vm348_vm2, %v1585_v9  ;;  %5009 = vmatprep.mubr.msk.f32.mxu1 %vm5542_vm1, %v5541_v20  ;;  %v5285_v9 = vpack.c.bf16 %v2056_v8, %v2055_v7 }
 0x752   :  { %5017 = vmatprep.subr.mxu1 %v5541_v20  ;;  %v1661_v17 = vpop.permute.xlu0 %1660 }
 0x754   :  { %5010 = vmatmul.mubr.msk.f32.vlgmr.msra.gmra.mrb[22].mxu1 %vm348_vm2, %v1583_v10  ;;  %v2147_v10 = vld [vmem:[%s6361_s13] sm:$0xff] }
 0x755   :  { %5019 = vmatprep.mubr.msk.f32.mxu1 %vm5542_vm1, %v5541_v20 }
 0x81f   :  { %v1419_v11 = vpop.f32.mrb[8].mxu0 }
 0x820   :  { %v4996_v13 = vpop.f32.mrb[9].mxu0  ;;  %5004 = vmatprep.mubr.msk.f32.mxu0 %vm348_vm2, %v1419_v11  ;;  %v2148_v11 = vld [vmem:[%s6361_s13 + $0x8] sm:$0xff] }
 0x821   :  { %v2149_v13 = vld [vmem:[%s6361_s13 + $0x10] sm:$0xff] }
 0x823   :  { %v1495_v15 = vpop.f32.mrb[20].mxu1 }
 0x824   :  { %v5001_v16 = vpop.f32.mrb[21].mxu1  ;;  %5005 = vmatmul.mubr.msk.f32.vlgmr.msra.gmra.mrb[6].mxu0 %vm348_vm2, %v1495_v15  ;;  %v2150_v15 = vld [vmem:[%s6361_s13 + $0x18] sm:$0xff] }
 0x825   :  { %5013 = vmatpush3.xpose.msk.msra.mxu0 %vm348_vm2, %v1663_v14  ;;  %5014 = vmatprep.mubr.msk.f32.mxu0 %vm5542_vm1, %v5541_v20  ;;  %v5289_v14 = vpack.c.bf16 %v2148_v11, %v2147_v10  ;;  %v5293_v16 = vpack.c.bf16 %v2150_v15, %v2149_v13  ;;  %v4630_v15 = vld [vmem:[%s6381_s21 + $0x28] sm:$0xff] }
 0x826   :  { %5022 = vmatprep.subr.mxu0 %v5541_v20 }
 0x827   :  { %v1656_v18 = vpop.f32.mrb[22].mxu1 }
 0x828   :  { %v1738_v19 = vmul.f32 0.17677669, %v1656_v18  ;;  %v5011_v21 = vpop.f32.mrb[23].mxu1  ;;  %5015 = vmatmul.mubr.msk.f32.vlgmr.msra.gmra.mrb[10].mxu0 %vm348_vm2, %v1661_v17  ;;  %v2151_v17 = vld [vmem:[%s6361_s13 + $0x20] sm:$0xff]  ;;  %v2152_v18 = vld [vmem:[%s6361_s13 + $0x28] sm:$0xff] }
 0x829   :  { %5024 = vmatprep.mubr.msk.f32.mxu0 %vm5542_vm1, %v5541_v20  ;;  %v2153_v21 = vld [vmem:[%s6361_s13 + $0x30] sm:$0xff] }
 0x82a   :  { %v1740_v22 = vsel %vm348_vm2, %v1738_v19, -inf }
 0x82b   :  { %1741 = vmax.xlane.f32.xlu0 %v1740_v22  ;;  %v2154_v22 = vld [vmem:[%s6361_s13 + $0x38] sm:$0xff] }
 0x8b8   :  { %v1742_v23 = vpop.xlane.xlu0 %1741 }
 0x8b9   :  { %v1746_v24 = vsub.f32 %v1738_v19, %v1742_v23  ;;  %v5297_v19 = vpack.c.bf16 %v2152_v18, %v2151_v17  ;;  %v5301_v23 = vpack.c.bf16 %v2154_v22, %v2153_v21  ;;  %v4631_v17 = vld [vmem:[%s6381_s21 + $0x30] sm:$0xff]  ;;  %v4632_v18 = vld [vmem:[%s6381_s21 + $0x38] sm:$0xff]  ;;  %v4637_v21 = vld [vmem:[%s6382_s28 + $0x20] sm:$0xff] }
 0x8ba   :  { %v4638_v22 = vld [vmem:[%s6382_s28 + $0x28] sm:$0xff] }
 0x8bb   :  { %v1748_v26 = vmul.f32 1.442695, %v1746_v24  ;;  %v2155_v24 = vld [vmem:[%s6361_s13 + $0x40] sm:$0xff] }
 0x8bd   :  { %5430 = vpow2.f32 %v1748_v26  ;;  %v2156_v26 = vld [vmem:[%s6361_s13 + $0x48] sm:$0xff] }
 0x8c7   :  { %v5431_v27 = vpop.eup %5430 }
 0x8c8   :  { %v1752_v31 = vsel %vm348_vm2, %v5431_v27, 0.0 }
 0x8c9   :  { %1753 = vadd.xlane.f32.xlu0 %v1752_v31  ;;  %v2157_v31 = vld [vmem:[%s6361_s13 + $0x50] sm:$0xff] }
 0x8fb   :  { %v1734_v32 = vpop.f32.mrb[10].mxu0 }
 0x8fc   :  { %v1739_v34 = vmul.f32 0.17677669, %v1734_v32  ;;  %v5016_v36 = vpop.f32.mrb[11].mxu0  ;;  %v2158_v32 = vld [vmem:[%s6361_s13 + $0x58] sm:$0xff] }
 0x8fd   :  { %v2159_v36 = vld [vmem:[%s6361_s13 + $0x60] sm:$0xff] }
 0x8fe   :  { %v1743_v37 = vsel %vm348_vm2, %v1739_v34, -inf }
 0x8ff   :  { %1744 = vmax.xlane.f32.xlu1 %v1743_v37  ;;  %v2160_v37 = vld [vmem:[%s6361_s13 + $0x68] sm:$0xff] }
 0x910   :  { %1838 = vrot.lane.b32.xlu1 %v5755_v33, %s6374_s23 }
 0x956   :  { %v1754_v44 = vpop.xlane.xlu0 %1753 }
 0x98c   :  { %v1745_v38 = vpop.xlane.xlu1 %1744 }
 0x98d   :  { %v1747_v39 = vsub.f32 %v1739_v34, %v1745_v38  ;;  %v5309_v34 = vpack.c.bf16 %v2158_v32, %v2157_v31  ;;  %v5313_v38 = vpack.c.bf16 %v2160_v37, %v2159_v36  ;;  %v4627_v37 = vld [vmem:[%s6363_s15] ss:$0 sm:$0xff] }
 0x98f   :  { %v1750_v40 = vmul.f32 1.442695, %v1747_v39 }
 0x990   :  { %v1839_v41 = vpop.permute.xlu1 %1838 }
 0x991   :  { %5432 = vpow2.f32 %v1750_v40  ;;  %5023 = vmatpush3.msra.mxu0 %v1839_v41 }
 0x992   :  { %5434 = vrcp.f32 %v1754_v44  ;;  %5027 = vmatprep.subr.mxu0 %v347_v50 }
 0x99b   :  { %v5433_v42 = vpop.eup %5432 }
 0x99c   :  { %v1755_v43 = vsel %vm348_vm2, %v5433_v42, 0.0  ;;  %v5435_v46 = vpop.eup %5434 }
 0x99d   :  { %1756 = vadd.xlane.f32.xlu0 %v1755_v43  ;;  %v1760_v47 = vmul.f32 %v5435_v46, %v5431_v27  ;;  %v5305_v27 = vpack.c.bf16 %v2156_v26, %v2155_v24  ;;  %v4621_v46 = vld [vmem:[%s6357_s9] ss:$0 sm:$0xff] }
 0x9b3   :  { %1762 = vrot.lane.b32.xlu0 %v5757_v35, %s6374_s23 }
 0xa2a   :  { %v1757_v45 = vpop.xlane.xlu0 %1756 }
 0xa2b   :  { %5436 = vrcp.f32 %v1757_v45 }
 0xa2e   :  { %v1763_v33 = vpop.permute.xlu0 %1762 }
 0xa2f   :  { %5018 = vmatpush3.msra.mxu1 %v1763_v33  ;;  %v4622_v33 = vld [vmem:[%s6358_s10] ss:$0 sm:$0xff] }
 0xa30   :  { %5020 = vmatmul.mubr.msk.f32.vlgmr.msra.gmra.mrb[24].mxu1 %vm348_vm2, %v1760_v47  ;;  %5282 = vmatprep.subr.bf16.mxu1 %v5281_v1 }
 0xa31   :  { %5284 = vmatpush3.bf16.msra.mxu1 %v5281_v1 }
 0xa32   :  { %5286 = vmatprep.subr.bf16.mxu1 %v5285_v9 }
 0xa35   :  { %v5437_v48 = vpop.eup %5436  ;;  %5288 = vmatpush3.bf16.msra.mxu1 %v5285_v9 }
 0xa36   :  { %v1761_v49 = vmul.f32 %v5437_v48, %v5433_v42 }
 0xa38   :  { %5025 = vmatmul.mubr.msk.f32.vlgmr.msra.gmra.mrb[12].mxu0 %vm348_vm2, %v1761_v49 }
 0xa39   :  { %5028 = vmatpush3.msra.mxu0 %v347_v50 }
 0xa3a   :  { %5290 = vmatprep.subr.bf16.mxu0 %v5289_v14 }
 0xb03   :  { %v1834_v35 = vpop.f32.mrb[24].mxu1 }
 0xb04   :  { %v5021_v51 = vpop.f32.mrb[25].mxu1  ;;  %5029 = vmatprep.mubr.msk.f32.mxu0 %vm348_vm2, %v1834_v35 }
 0xb0b   :  { %v1910_v52 = vpop.f32.mrb[12].mxu0 }
 0xb0c   :  { %v5026_v53 = vpop.f32.mrb[13].mxu0  ;;  %5030 = vmatmul.mubr.msk.f32.vlgmr.msra.gmra.mrb[6].mxu0 %vm348_vm2, %v1910_v52 }
 0xb0d   :  { %5292 = vmatpush3.bf16.msra.mxu0 %v5289_v14  ;;  %v2161_v53 = vld [vmem:[%s6361_s13 + $0x70] sm:$0xff]  ;;  %v4629_v14 = vld [vmem:[%s6381_s21 + $0x20] sm:$0xff] }
 0xb0e   :  { %5294 = vmatprep.subr.bf16.mxu0 %v5293_v16 }
 0xb11   :  { %5296 = vmatpush3.bf16.msra.mxu0 %v5293_v16  ;;  %v5321_v16 = vpack.c.bf16 %v4630_v15, %v4629_v14 }
 0xb12   :  { %5298 = vmatprep.subr.bf16.mxu0 %v5297_v19 }
 0xb13   :  { %5322 = vmatprep.subr.bf16.mxu1 %v5321_v16 }
 0xb15   :  { %5300 = vmatpush3.bf16.msra.mxu0 %v5297_v19  ;;  %v5325_v19 = vpack.c.bf16 %v4632_v18, %v4631_v17 }
 0xb16   :  { %5302 = vmatprep.subr.bf16.mxu0 %v5301_v23 }
 0xb19   :  { %5304 = vmatpush3.bf16.msra.mxu0 %v5301_v23  ;;  %v5329_v23 = vpack.c.bf16 %v4638_v22, %v4637_v21 }
 0xb1a   :  { %5306 = vmatprep.subr.bf16.mxu0 %v5305_v27 }
 0xb1d   :  { %5308 = vmatpush3.bf16.msra.mxu0 %v5305_v27 }
 0xb1e   :  { %5310 = vmatprep.subr.bf16.mxu0 %v5309_v34 }
 0xb21   :  { %5312 = vmatpush3.bf16.msra.mxu0 %v5309_v34 }
 0xb22   :  { %5314 = vmatprep.subr.bf16.mxu0 %v5313_v38 }
 0xb25   :  { %5316 = vmatpush3.bf16.msra.mxu0 %v5313_v38 }
 0xbdf   :  { %v5031_v55 = vpop.f32.mrb[6].mxu0 }
 0xbe0   :  { %v2005_v56 = vadd.f32 %v5031_v55, %v4620_v54  ;;  %v1986_v57 = vpop.f32.mrb[7].mxu0 }
 0xbe1   :  { %v2004_v58 = vadd.f32 %v4620_v54, %v1986_v57  ;;  %v2162_v54 = vld [vmem:[%s6361_s13 + $0x78] sm:$0xff] }
 0xbe2   :  { %v2007_v59 = vadd.f32 %v2005_v56, %v5690_v12  ;;  %v5317_v55 = vpack.c.bf16 %v2162_v54, %v2161_v53  ;;  %v4623_v56 = vld [vmem:[%s6360_s12] ss:$0 sm:$0xff] }
 0xbe3   :  { %v2006_v60 = vadd.f32 %v2004_v58, %v5674_v5 }
 0xbe4   :  { %v2013_v61 = vsel %vm90_vm0, %v2007_v59, 0.0  ;;  %5318 = vmatprep.subr.bf16.mxu0 %v5317_v55 }
 0xbe5   :  { %2014 = vadd.xlane.f32.xlu1 %v2013_v61  ;;  %v2010_v62 = vsel %vm90_vm0, %v2006_v60, 0.0  ;;  %5320 = vmatpush3.bf16.msra.mxu0 %v5317_v55  ;;  %v4642_v55 = vld [vmem:[%s6352_s4 + $0x1] ss:$0 sm:$0xff]  ;;  %s6384_s4 = smov 104  }
 0xbe6   :  { %2011 = vadd.xlane.f32.xlu0 %v2010_v62  ;;  %5121 = vmatprep.subr.mxu0 %v5541_v20 }
 0xc72   :  { %v2015_v63 = vpop.xlane.xlu1 %2014 }
 0xc73   :  { %v2018_v0 = vmul.f32 0.03125, %v2015_v63  ;;  %v2012_v2 = vpop.xlane.xlu0 %2011  ;;  %v4626_v63 = vld [vmem:[%s6362_s14] ss:$0 sm:$0xff] }
 0xc74   :  { %v2017_v3 = vmul.f32 0.03125, %v2012_v2 }
 0xc75   :  { %v5898_v25 = vsub.f32 %v2007_v59, %v2018_v0 }
 0xc76   :  { %v2019_v28 = vsub.f32 %v2006_v60, %v2017_v3 }
 0xc77   :  { %v2022_v12 = vmul.f32 %v5898_v25, %v5898_v25 }
 0xc78   :  { %v2021_v29 = vmul.f32 %v2019_v28, %v2019_v28 }
 0xc79   :  { %v2026_v5 = vsel %vm90_vm0, %v2022_v12, 0.0 }
 0xc7a   :  { %v2023_v30 = vsel %vm90_vm0, %v2021_v29, 0.0 }
 0xc7b   :  { %2024 = vadd.xlane.f32.xlu0 %v2023_v30 }
 0xc7f   :  { %2027 = vadd.xlane.f32.xlu0 %v2026_v5 }
 0xd08   :  { %v2025_v39 = vpop.xlane.xlu0 %2024 }
 0xd09   :  { %v2029_v40 = vmul.f32 0.03125, %v2025_v39 }
 0xd0b   :  { %v2031_v41 = vadd.f32 1e-05, %v2029_v40 }
 0xd0c   :  { %v2028_v42 = vpop.xlane.xlu0 %2027 }
 0xd0d   :  { %5438 = vrsqrt.f32 %v2031_v41  ;;  %v2030_v43 = vmul.f32 0.03125, %v2028_v42  ;;  %v4628_v41 = vld [vmem:[%s6364_s16] ss:$0 sm:$0xff] }
 0xd0f   :  { %v2032_v44 = vadd.f32 1e-05, %v2030_v43 }
 0xd11   :  { %5440 = vrsqrt.f32 %v2032_v44  ;;  %v4639_v44 = vld [vmem:[%s6382_s28 + $0x30] sm:$0xff] }
 0xd17   :  { %v5439_v45 = vpop.eup %5438 }
 0xd18   :  { %v2035_v47 = vmul.f32 %v5439_v45, %v2019_v28  ;;  %v4640_v45 = vld [vmem:[%s6382_s28 + $0x38] sm:$0xff] }
 0xd1a   :  { %v2043_v48 = vmul.f32 %v4621_v46, %v2035_v47 }
 0xd1b   :  { %v5441_v49 = vpop.eup %5440 }
 0xd1c   :  { %v2036_v50 = vmul.f32 %v5441_v49, %v5898_v25  ;;  %v2051_v35 = vadd.f32 %v4622_v33, %v2043_v48  ;;  %v4645_v48 = vld [vmem:[%s6353_s5 + $0x20] sm:$0xff]  ;;  %v4646_v49 = vld [vmem:[%s6353_s5 + $0x28] sm:$0xff] }
 0xd1e   :  { %v2044_v51 = vmul.f32 %v4621_v46, %v2036_v50  ;;  %5040 = vmatprep.mubr.msk.f32.mxu1 %vm90_vm0, %v2051_v35  ;;  %v5337_v50 = vpack.c.bf16 %v4646_v49, %v4645_v48 }
 0xd20   :  { %v2052_v52 = vadd.f32 %v4622_v33, %v2044_v51  ;;  %v5333_v33 = vpack.c.bf16 %v4640_v45, %v4639_v44  ;;  %v4648_v51 = vld [vmem:[%s6353_s5 + $0x38] sm:$0xff] }
 0xd22   :  { %5041 = vmatmul.mubr.msk.f32.vlgmr.msra.gmra.mrb[26].mxu1 %vm90_vm0, %v2052_v52 }
 0xd23   :  { %5324 = vmatpush3.bf16.msra.mxu1 %v5321_v16 }
 0xd24   :  { %5326 = vmatprep.subr.bf16.mxu1 %v5325_v19 }
 0xd27   :  { %5328 = vmatpush3.bf16.msra.mxu1 %v5325_v19 }
 0xd28   :  { %5330 = vmatprep.subr.bf16.mxu1 %v5329_v23 }
 0xdf5   :  { %v5042_v57 = vpop.f32.mrb[26].mxu1 }
 0xdf6   :  { %v2142_v58 = vadd.f32 %v5042_v57, %v4623_v56  ;;  %v2136_v59 = vpop.f32.mrb[27].mxu1 }
 0xdf7   :  { %v2137_v60 = vadd.f32 %v4623_v56, %v2136_v59 }
 0xdf8   :  { %v2146_v62 = vmax.f32 %v2142_v58, 0.0  ;;  %v4634_v58 = vld [vmem:[%s6383_s25 + $0x1] ss:$0 sm:$0xff] }
 0xdf9   :  { %v2145_v61 = vmax.f32 %v2137_v60, 0.0 }
 0xdfb   :  { %5075 = vmatprep.mubr.f32.mxu0 %v2145_v61 }
 0xdfc   :  { %5076 = vmatmul.mubr.f32.vlgmr.msra.gmra.mrb[14].mxu0 %v2146_v62  ;;  %v4650_v62 = vld [vmem:[%s6354_s6 + $0x1] ss:$0 sm:$0xff] }
 0xdfd   :  { %5123 = vmatprep.mubr.msk.f32.mxu0 %vm5542_vm1, %v5541_v20 }
 0xecf   :  { %v5077_v0 = vpop.f32.mrb[14].mxu0 }
 0xed0   :  { %v2242_v2 = vadd.f32 %v5077_v0, %v4626_v63  ;;  %v2236_v3 = vpop.f32.mrb[15].mxu0 }
 0xed1   :  { %v2237_v25 = vadd.f32 %v4626_v63, %v2236_v3 }
 0xed2   :  { %v2246_v28 = vadd.f32 %v2242_v2, %v2052_v52 }
 0xed3   :  { %v2245_v29 = vadd.f32 %v2237_v25, %v2051_v35  ;;  %v4647_v35 = vld [vmem:[%s6353_s5 + $0x30] sm:$0xff] }
 0xed4   :  { %v2252_v30 = vsel %vm90_vm0, %v2246_v28, 0.0  ;;  %v5341_v52 = vpack.c.bf16 %v4648_v51, %v4647_v35 }
 0xed5   :  { %2253 = vadd.xlane.f32.xlu1 %v2252_v30  ;;  %v2249_v12 = vsel %vm90_vm0, %v2245_v29, 0.0 }
 0xed6   :  { %2250 = vadd.xlane.f32.xlu0 %v2249_v12 }
 0xf62   :  { %v2254_v5 = vpop.xlane.xlu1 %2253 }
 0xf63   :  { %v2256_v4 = vmul.f32 0.03125, %v2254_v5  ;;  %v2251_v6 = vpop.xlane.xlu0 %2250 }
 0xf64   :  { %v2255_v1 = vmul.f32 0.03125, %v2251_v6 }
 0xf65   :  { %v2258_v7 = vsub.f32 %v2246_v28, %v2256_v4 }
 0xf66   :  { %v2257_v8 = vsub.f32 %v2245_v29, %v2255_v1 }
 0xf67   :  { %v2260_v9 = vmul.f32 %v2258_v7, %v2258_v7 }
 0xf68   :  { %v2259_v10 = vmul.f32 %v2257_v8, %v2257_v8 }
 0xf69   :  { %v2264_v11 = vsel %vm90_vm0, %v2260_v9, 0.0 }
 0xf6a   :  { %2265 = vadd.xlane.f32.xlu1 %v2264_v11  ;;  %v2261_v13 = vsel %vm90_vm0, %v2259_v10, 0.0 }
 0xf6b   :  { %2262 = vadd.xlane.f32.xlu0 %v2261_v13 }
 0xff7   :  { %v2266_v24 = vpop.xlane.xlu1 %2265 }
 0xff8   :  { %v2268_v26 = vmul.f32 0.03125, %v2266_v24  ;;  %v2263_v27 = vpop.xlane.xlu0 %2262 }
 0xff9   :  { %v2267_v31 = vmul.f32 0.03125, %v2263_v27 }
 0xffa   :  { %v2270_v32 = vadd.f32 1e-05, %v2268_v26 }
 0xffb   :  { %v2269_v34 = vadd.f32 1e-05, %v2267_v31 }
 0xffc   :  { %5442 = vrsqrt.f32 %v2270_v32 }
 0xffd   :  { %5444 = vrsqrt.f32 %v2269_v34 }
0x1006   :  { %v5443_v36 = vpop.eup %5442 }
0x1007   :  { %v5445_v38 = vpop.eup %5444  ;;  %v2274_v39 = vmul.f32 %v5443_v36, %v2258_v7 }
0x1008   :  { %v2273_v40 = vmul.f32 %v5445_v38, %v2257_v8 }
0x1009   :  { %v2282_v42 = vmul.f32 %v4627_v37, %v2274_v39 }
0x100a   :  { %v2281_v43 = vmul.f32 %v4627_v37, %v2273_v40 }
0x100b   :  { %v6018_v47 = vadd.f32 %v4628_v41, %v2282_v42 }
0x100c   :  { %v6016_v46 = vadd.f32 %v4628_v41, %v2281_v43 }
0x100e   :  { %5086 = vmatprep.mubr.msk.f32.mxu1 %vm90_vm0, %v6016_v46 }
0x100f   :  { %5087 = vmatmul.mubr.msk.f32.vlgmr.msra.gmra.mrb[28].mxu1 %vm90_vm0, %v6018_v47 }
0x1010   :  { %5332 = vmatpush3.bf16.msra.mxu1 %v5329_v23  ;;  %5097 = vmatprep.mubr.msk.f32.mxu1 %vm90_vm0, %v6016_v46 }
0x1011   :  { %5334 = vmatprep.subr.bf16.mxu1 %v5333_v33 }
0x1014   :  { %5336 = vmatpush3.bf16.msra.mxu1 %v5333_v33 }
0x1015   :  { %5338 = vmatprep.subr.bf16.mxu1 %v5337_v50 }
0x1017   :  { %5098 = vmatmul.mubr.msk.f32.vlgmr.msra.gmra.mrb[30].mxu1 %vm90_vm0, %v6018_v47 }
0x1018   :  { %5340 = vmatpush3.bf16.msra.mxu1 %v5337_v50  ;;  %5108 = vmatprep.mubr.msk.f32.mxu1 %vm90_vm0, %v6016_v46 }
0x1019   :  { %5342 = vmatprep.subr.bf16.mxu1 %v5341_v52 }
0x101c   :  { %5344 = vmatpush3.bf16.msra.mxu1 %v5341_v52 }
0x101d   :  { %5111 = vmatprep.subr.mxu1 %v5541_v20 }
0x101f   :  { %5109 = vmatmul.mubr.msk.f32.vlgmr.msra.gmra.mrb[32].mxu1 %vm90_vm0, %v6018_v47 }
0x1020   :  { %5113 = vmatprep.mubr.msk.f32.mxu1 %vm5542_vm1, %v5541_v20 }
0x10e2   :  { %v5088_v53 = vpop.f32.mrb[28].mxu1 }
0x10e3   :  { %v2376_v54 = vpop.f32.mrb[29].mxu1  ;;  %v6071_v0 = vadd.f32 %v5088_v53, %v4634_v58 }
0x10e4   :  { %v6057_v60 = vadd.f32 %v4634_v58, %v2376_v54 }
0x10ea   :  { %v5099_v56 = vpop.f32.mrb[30].mxu1 }
0x10eb   :  { %v2464_v57 = vpop.f32.mrb[31].mxu1  ;;  %v6060_v61 = vadd.f32 %v5099_v56, %v4642_v55 }
0x10ec   :  { %v6053_v59 = vadd.f32 %v4642_v55, %v2464_v57 }
0x10ee   :  { %5112 = vmatpush3.xpose.msk.msra.mxu1 %vm348_vm2, %v6053_v59 }
0x10ef   :  { %5116 = vmatprep.subr.mxu1 %v5541_v20 }
0x10f1   :  { %5114 = vmatmul.mubr.msk.f32.vlgmr.msra.gmra.mrb[34].mxu1 %vm348_vm2, %v6057_v60 }
0x10f2   :  { %v5110_v63 = vpop.f32.mrb[32].mxu1  ;;  %5117 = vmatpush3.xpose.msk.msra.mxu1 %vm348_vm2, %v6060_v61  ;;  %5118 = vmatprep.mubr.msk.f32.mxu1 %vm5542_vm1, %v5541_v20 }
0x10f3   :  { %v6073_v2 = vadd.f32 %v5110_v63, %v4650_v62  ;;  %v2552_v3 = vpop.f32.mrb[33].mxu1  ;;  %5126 = vmatprep.subr.mxu1 %v5541_v20 }
0x10f4   :  { %v6076_v25 = vadd.f32 %v4650_v62, %v2552_v3 }
0x10f5   :  { %5119 = vmatmul.mubr.msk.f32.vlgmr.msra.gmra.mrb[36].mxu1 %vm348_vm2, %v6071_v0 }
0x10f6   :  { %5122 = vmatpush3.msra.mxu0 %v6076_v25  ;;  %5127 = vmatpush3.msra.mxu1 %v6073_v2 }
0x10f7   :  { %5128 = vmatprep.mubr.msk.f32.mxu1 %vm5542_vm1, %v5541_v20  ;;  %5136 = vmatprep.subr.mxu1 %v5541_v20 }
0x10f8   :  { %5131 = vmatprep.subr.mxu0 %v5541_v20 }
0x11c4   :  { %v2638_v28 = vpop.f32.mrb[34].mxu1 }
0x11c5   :  { %v5115_v29 = vpop.f32.mrb[35].mxu1  ;;  %v2718_v10 = vmul.f32 0.17677669, %v2638_v28 }
0x11c7   :  { %v2720_v11 = vsel %vm348_vm2, %v2718_v10, -inf }
0x11c8   :  { %v2714_v30 = vpop.f32.mrb[36].mxu1 }
0x11c9   :  { %v2719_v12 = vmul.f32 0.17677669, %v2714_v30  ;;  %v5120_v5 = vpop.f32.mrb[37].mxu1 }
0x11cb   :  { %v2723_v4 = vsel %vm348_vm2, %v2719_v12, -inf }
0x11cc   :  { %2724 = vmax.xlane.f32.xlu0 %v2723_v4 }
0x11e2   :  { %2968 = vrot.lane.b32.xlu0 %v6060_v61, %s5543_s3 }
0x1259   :  { %v2725_v6 = vpop.xlane.xlu0 %2724 }
0x125a   :  { %v2727_v1 = vsub.f32 %v2719_v12, %v2725_v6 }
0x125c   :  { %v2730_v7 = vmul.f32 1.442695, %v2727_v1 }
0x125d   :  { %v2969_v16 = vpop.permute.xlu0 %2968 }
0x125e   :  { %5446 = vpow2.f32 %v2730_v7 }
0x1268   :  { %v5447_v8 = vpop.eup %5446 }
0x1269   :  { %v2735_v9 = vsel %vm348_vm2, %v5447_v8, 0.0 }
0x126a   :  { %2736 = vadd.xlane.f32.xlu1 %v2735_v9 }
0x127b   :  { %2966 = vrot.lane.b32.xlu1 %v6071_v0, %s5543_s3 }
0x129f   :  { %2721 = vmax.xlane.f32.xlu1 %v2720_v11 }
0x12b0   :  { %2888 = vrot.lane.b32.xlu1 %v6057_v60, %s5543_s3 }
0x12f7   :  { %v2737_v13 = vpop.xlane.xlu1 %2736 }
0x12f8   :  { %5448 = vrcp.f32 %v2737_v13 }
0x12fb   :  { %v2967_v17 = vpop.permute.xlu1 %2966 }
0x1302   :  { %v5449_v14 = vpop.eup %5448 }
0x1303   :  { %v2741_v15 = vmul.f32 %v5449_v14, %v5447_v8 }
0x1305   :  { %5129 = vmatmul.mubr.msk.f32.vlgmr.msra.gmra.mrb[38].mxu1 %vm348_vm2, %v2741_v15  ;;  %v4654_v15 = vld [vmem:[%s6355_s7 + $0x28] sm:$0xff] }
0x1306   :  { %5137 = vmatpush3.xpose.msk.msra.mxu1 %vm348_vm2, %v2969_v16  ;;  %5138 = vmatprep.mubr.msk.f32.mxu1 %vm5542_vm1, %v5541_v20  ;;  %v4653_v16 = vld [vmem:[%s6355_s7 + $0x20] sm:$0xff] }
0x1307   :  { %5146 = vmatprep.subr.mxu1 %v5541_v20 }
0x1309   :  { %5139 = vmatmul.mubr.msk.f32.vlgmr.msra.gmra.mrb[40].mxu1 %vm348_vm2, %v2967_v17 }
0x130a   :  { %5148 = vmatprep.mubr.msk.f32.mxu1 %vm5542_vm1, %v5541_v20 }
0x132c   :  { %v2722_v18 = vpop.xlane.xlu1 %2721 }
0x132d   :  { %v2726_v19 = vsub.f32 %v2718_v10, %v2722_v18 }
0x132f   :  { %v2728_v21 = vmul.f32 1.442695, %v2726_v19 }
0x1330   :  { %v2889_v36 = vpop.permute.xlu1 %2888 }
0x1331   :  { %5450 = vpow2.f32 %v2728_v21 }
0x133b   :  { %v5451_v22 = vpop.eup %5450 }
0x133c   :  { %v2732_v23 = vsel %vm348_vm2, %v5451_v22, 0.0 }
0x133d   :  { %2733 = vadd.xlane.f32.xlu0 %v2732_v23 }
0x1353   :  { %2890 = vrot.lane.b32.xlu0 %v6053_v59, %s5543_s3 }
0x13ca   :  { %v2734_v24 = vpop.xlane.xlu0 %2733 }
0x13cb   :  { %5452 = vrcp.f32 %v2734_v24 }
0x13ce   :  { %v2891_v31 = vpop.permute.xlu0 %2890 }
0x13d5   :  { %v5453_v26 = vpop.eup %5452 }
0x13d6   :  { %v2740_v27 = vmul.f32 %v5453_v26, %v5451_v22 }
0x13d8   :  { %5124 = vmatmul.mubr.msk.f32.vlgmr.msra.gmra.mrb[16].mxu0 %vm348_vm2, %v2740_v27  ;;  %v6107_v32 = vpop.f32.mrb[38].mxu1 }
0x13d9   :  { %5132 = vmatpush3.xpose.msk.msra.mxu0 %vm348_vm2, %v2891_v31  ;;  %v5130_v34 = vpop.f32.mrb[39].mxu1  ;;  %5133 = vmatprep.mubr.msk.f32.mxu0 %vm5542_vm1, %v5541_v20 }
0x13da   :  { %5141 = vmatprep.subr.mxu0 %v5541_v20 }
0x13dc   :  { %5134 = vmatmul.mubr.msk.f32.vlgmr.msra.gmra.mrb[18].mxu0 %vm348_vm2, %v2889_v36  ;;  %v3040_v37 = vpop.f32.mrb[40].mxu1 }
0x13dd   :  { %v3045_v38 = vmul.f32 0.17677669, %v3040_v37  ;;  %v5140_v39 = vpop.f32.mrb[41].mxu1  ;;  %5143 = vmatprep.mubr.msk.f32.mxu0 %vm5542_vm1, %v5541_v20 }
0x13df   :  { %v3049_v40 = vsel %vm348_vm2, %v3045_v38, -inf }
0x13e0   :  { %3050 = vmax.xlane.f32.xlu1 %v3049_v40 }
0x13f1   :  { %3386 = vrot.lane.b32.xlu1 %v6053_v59, %s5544_s29 }
0x13f5   :  { %3384 = vrot.lane.b32.xlu1 %v6057_v60, %s5544_s29 }
0x13f9   :  { %3464 = vrot.lane.b32.xlu1 %v6060_v61, %s5544_s29 }
0x146d   :  { %v3051_v41 = vpop.xlane.xlu1 %3050 }
0x146e   :  { %v3053_v42 = vsub.f32 %v3045_v38, %v3051_v41  ;;  %v4655_v38 = vld [vmem:[%s6355_s7 + $0x30] sm:$0xff] }
0x1470   :  { %v3056_v43 = vmul.f32 1.442695, %v3053_v42 }
0x1471   :  { %v3387_v54 = vpop.permute.xlu1 %3386 }
0x1472   :  { %5454 = vpow2.f32 %v3056_v43 }
0x1475   :  { %v3385_v56 = vpop.permute.xlu1 %3384 }
0x1479   :  { %v3465_v58 = vpop.permute.xlu1 %3464 }
0x147c   :  { %v5455_v44 = vpop.eup %5454 }
0x147d   :  { %v3061_v45 = vsel %vm348_vm2, %v5455_v44, 0.0 }
0x147e   :  { %3062 = vadd.xlane.f32.xlu0 %v3061_v45 }
0x1494   :  { %3146 = vrot.lane.b32.xlu0 %v6073_v2, %s5543_s3 }
0x1498   :  { %3462 = vrot.lane.b32.xlu0 %v6071_v0, %s5544_s29 }
0x14ab   :  { %v6128_v33 = vpop.f32.mrb[16].mxu0 }
0x14ac   :  { %v5125_v48 = vpop.f32.mrb[17].mxu0 }
0x14af   :  { %v2962_v49 = vpop.f32.mrb[18].mxu0 }
0x14b0   :  { %v3044_v50 = vmul.f32 0.17677669, %v2962_v49  ;;  %v5135_v35 = vpop.f32.mrb[19].mxu0 }
0x14b2   :  { %v3046_v51 = vsel %vm348_vm2, %v3044_v50, -inf }
0x14b3   :  { %3047 = vmax.xlane.f32.xlu1 %v3046_v51 }
0x150b   :  { %v3063_v52 = vpop.xlane.xlu0 %3062 }
0x150c   :  { %5456 = vrcp.f32 %v3063_v52 }
0x150f   :  { %v3147_v53 = vpop.permute.xlu0 %3146 }
0x1510   :  { %5147 = vmatpush3.msra.mxu1 %v3147_v53 }
0x1511   :  { %5161 = vmatprep.subr.mxu1 %v5541_v20 }
0x1513   :  { %v3463_v62 = vpop.permute.xlu0 %3462 }
0x1516   :  { %v5457_v55 = vpop.eup %5456 }
0x1517   :  { %v3067_v57 = vmul.f32 %v5457_v55, %v5455_v44 }
0x1519   :  { %5149 = vmatmul.mubr.msk.f32.vlgmr.msra.gmra.mrb[42].mxu1 %vm348_vm2, %v3067_v57 }
0x151a   :  { %5162 = vmatpush3.xpose.msk.msra.mxu1 %vm348_vm2, %v3387_v54  ;;  %5163 = vmatprep.mubr.msk.f32.mxu1 %vm5542_vm1, %v5541_v20 }
0x151b   :  { %5166 = vmatprep.subr.mxu1 %v5541_v20 }
0x151d   :  { %5164 = vmatmul.mubr.msk.f32.vlgmr.msra.gmra.mrb[44].mxu1 %vm348_vm2, %v3385_v56 }
0x151e   :  { %5167 = vmatpush3.xpose.msk.msra.mxu1 %vm348_vm2, %v3465_v58  ;;  %5168 = vmatprep.mubr.msk.f32.mxu1 %vm5542_vm1, %v5541_v20 }
0x151f   :  { %5176 = vmatprep.subr.mxu1 %v5541_v20 }
0x1521   :  { %5169 = vmatmul.mubr.msk.f32.vlgmr.msra.gmra.mrb[46].mxu1 %vm348_vm2, %v3463_v62 }
0x1522   :  { %5178 = vmatprep.mubr.msk.f32.mxu1 %vm5542_vm1, %v5541_v20 }
0x1540   :  { %v3048_v63 = vpop.xlane.xlu1 %3047 }
0x1541   :  { %v3052_v3 = vsub.f32 %v3044_v50, %v3048_v63 }
0x1543   :  { %v3054_v28 = vmul.f32 1.442695, %v3052_v3 }
0x1545   :  { %5458 = vpow2.f32 %v3054_v28 }
0x154f   :  { %v5459_v29 = vpop.eup %5458 }
0x1550   :  { %v3058_v30 = vsel %vm348_vm2, %v5459_v29, 0.0 }
0x1551   :  { %3059 = vadd.xlane.f32.xlu0 %v3058_v30 }
0x1567   :  { %3069 = vrot.lane.b32.xlu0 %v6076_v25, %s5543_s3 }
0x156b   :  { %3640 = vrot.lane.b32.xlu0 %v6073_v2, %s5544_s29 }
0x156f   :  { %3801 = vrot.lane.b32.xlu0 %v6053_v59, %s6384_s4 }
0x1573   :  { %3879 = vrot.lane.b32.xlu0 %v6060_v61, %s6384_s4 }
0x1577   :  { %3799 = vrot.lane.b32.xlu0 %v6057_v60, %s6384_s4 }
0x15de   :  { %v3060_v12 = vpop.xlane.xlu0 %3059 }
0x15df   :  { %5460 = vrcp.f32 %v3060_v12 }
0x15e2   :  { %v3070_v5 = vpop.permute.xlu0 %3069 }
0x15e3   :  { %5142 = vmatpush3.msra.mxu0 %v3070_v5 }
0x15e4   :  { %5151 = vmatprep.subr.mxu0 %v4654_v15 }
0x15e6   :  { %v3641_v4 = vpop.permute.xlu0 %3640 }
0x15e7   :  { %5177 = vmatpush3.msra.mxu1 %v3641_v4 }
0x15e8   :  { %5186 = vmatprep.subr.mxu1 %v5541_v20 }
0x15e9   :  { %v5461_v6 = vpop.eup %5460 }
0x15ea   :  { %v3066_v1 = vmul.f32 %v5461_v6, %v5459_v29  ;;  %v3802_v40 = vpop.permute.xlu0 %3801 }
0x15ec   :  { %5144 = vmatmul.mubr.msk.f32.vlgmr.msra.gmra.mrb[20].mxu0 %vm348_vm2, %v3066_v1  ;;  %v3218_v7 = vpop.f32.mrb[42].mxu1 }
0x15ed   :  { %v5150_v59 = vpop.f32.mrb[43].mxu1  ;;  %5152 = vmatpush3.msra.mxu0 %v4654_v15 }
0x15ee   :  { %5156 = vmatprep.subr.mxu0 %v4653_v16  ;;  %v3880_v43 = vpop.permute.xlu0 %3879 }
0x15f0   :  { %v3458_v8 = vpop.f32.mrb[44].mxu1 }
0x15f1   :  { %v3540_v9 = vmul.f32 0.17677669, %v3458_v8  ;;  %v5165_v61 = vpop.f32.mrb[45].mxu1 }
0x15f2   :  { %v3800_v45 = vpop.permute.xlu0 %3799 }
0x15f3   :  { %v3542_v10 = vsel %vm348_vm2, %v3540_v9, -inf }
0x15f4   :  { %3543 = vmax.xlane.f32.xlu1 %v3542_v10  ;;  %v3536_v60 = vpop.f32.mrb[46].mxu1  ;;  %v4656_v10 = vld [vmem:[%s6355_s7 + $0x38] sm:$0xff] }
0x15f5   :  { %v3541_v11 = vmul.f32 0.17677669, %v3536_v60  ;;  %v5170_v13 = vpop.f32.mrb[47].mxu1 }
0x15f7   :  { %v3545_v14 = vsel %vm348_vm2, %v3541_v11, -inf }
0x15f8   :  { %3546 = vmax.xlane.f32.xlu1 %v3545_v14  ;;  %v4690_v14 = vld [vmem:[%s6356_s8 + $0x1] ss:$0 sm:$0xff] }
0x1681   :  { %v3544_v17 = vpop.xlane.xlu1 %3543 }
0x1682   :  { %v3548_v18 = vsub.f32 %v3540_v9, %v3544_v17 }
0x1684   :  { %v3550_v19 = vmul.f32 1.442695, %v3548_v18 }
0x1685   :  { %v3547_v21 = vpop.xlane.xlu1 %3546 }
0x1686   :  { %5462 = vpow2.f32 %v3550_v19  ;;  %v3549_v22 = vsub.f32 %v3541_v11, %v3547_v21 }
0x1688   :  { %v3552_v23 = vmul.f32 1.442695, %v3549_v22 }
0x168a   :  { %5464 = vpow2.f32 %v3552_v23 }
0x1690   :  { %v5463_v24 = vpop.eup %5462 }
0x1691   :  { %v3554_v26 = vsel %vm348_vm2, %v5463_v24, 0.0 }
0x1692   :  { %3555 = vadd.xlane.f32.xlu1 %v3554_v26 }
0x1694   :  { %v5465_v27 = vpop.eup %5464 }
0x1695   :  { %v3557_v31 = vsel %vm348_vm2, %v5465_v27, 0.0 }
0x1696   :  { %3558 = vadd.xlane.f32.xlu1 %v3557_v31 }
0x16a7   :  { %3564 = vrot.lane.b32.xlu1 %v6076_v25, %s5544_s29 }
0x16ab   :  { %3877 = vrot.lane.b32.xlu1 %v6071_v0, %s6384_s4 }
0x16bf   :  { %v3141_v34 = vpop.f32.mrb[20].mxu0 }
0x16c0   :  { %v5145_v36 = vpop.f32.mrb[21].mxu0  ;;  %5153 = vmatprep.mubr.msk.f32.mxu0 %vm348_vm2, %v3141_v34 }
0x16c1   :  { %5154 = vmatmul.mubr.msk.f32.vlgmr.msra.gmra.mrb[22].mxu0 %vm348_vm2, %v3218_v7 }
0x16c2   :  { %5158 = vmatprep.mubr.msk.f32.mxu0 %vm348_vm2, %v6128_v33  ;;  %5157 = vmatpush3.msra.mxu0 %v4653_v16 }
0x16c3   :  { %5171 = vmatprep.subr.mxu0 %v5541_v20 }
0x16c9   :  { %5159 = vmatmul.mubr.msk.f32.vlgmr.msra.gmra.mrb[22].mxu0 %vm348_vm2, %v6107_v32 }
0x16ca   :  { %5173 = vmatprep.mubr.msk.f32.mxu0 %vm5542_vm1, %v5541_v20 }
0x171f   :  { %v3556_v37 = vpop.xlane.xlu1 %3555 }
0x1720   :  { %5466 = vrcp.f32 %v3556_v37 }
0x1723   :  { %v3559_v0 = vpop.xlane.xlu1 %3558 }
0x1724   :  { %5468 = vrcp.f32 %v3559_v0 }
0x1727   :  { %v3565_v39 = vpop.permute.xlu1 %3564 }
0x1728   :  { %5172 = vmatpush3.msra.mxu0 %v3565_v39  ;;  %v4696_v39 = vld [vmem:[%s6359_s11 + $0x28] sm:$0xff] }
0x1729   :  { %5181 = vmatprep.subr.mxu0 %v4655_v38 }
0x172a   :  { %v5467_v41 = vpop.eup %5466 }
0x172b   :  { %v3562_v42 = vmul.f32 %v5467_v41, %v5463_v24  ;;  %v3878_v35 = vpop.permute.xlu1 %3877  ;;  %v4697_v41 = vld [vmem:[%s6359_s11 + $0x30] sm:$0xff] }
0x172d   :  { %5174 = vmatmul.mubr.msk.f32.vlgmr.msra.gmra.mrb[24].mxu0 %vm348_vm2, %v3562_v42  ;;  %v4698_v42 = vld [vmem:[%s6359_s11 + $0x38] sm:$0xff] }
0x172e   :  { %v5469_v32 = vpop.eup %5468  ;;  %5182 = vmatpush3.msra.mxu0 %v4655_v38  ;;  %v4695_v38 = vld [vmem:[%s6359_s11 + $0x20] sm:$0xff] }
0x172f   :  { %v3563_v44 = vmul.f32 %v5469_v32, %v5465_v27  ;;  %5191 = vmatprep.subr.mxu0 %v5541_v20  ;;  %v5349_v32 = vpack.c.bf16 %v4698_v42, %v4697_v41 }
0x1731   :  { %5179 = vmatmul.mubr.msk.f32.vlgmr.msra.gmra.mrb[48].mxu1 %vm348_vm2, %v3563_v44  ;;  %v4704_v44 = vld [vmem:[%s6361_s13 + $0x88] sm:$0xff] }
0x1732   :  { %5187 = vmatpush3.xpose.msk.msra.mxu1 %vm348_vm2, %v3802_v40  ;;  %5188 = vmatprep.mubr.msk.f32.mxu1 %vm5542_vm1, %v5541_v20  ;;  %v5345_v40 = vpack.c.bf16 %v4696_v39, %v4695_v38 }
0x1733   :  { %5196 = vmatprep.subr.mxu1 %v5541_v20 }
0x1735   :  { %5189 = vmatmul.mubr.msk.f32.vlgmr.msra.gmra.mrb[50].mxu1 %vm348_vm2, %v3800_v45  ;;  %v4705_v45 = vld [vmem:[%s6361_s13 + $0x90] sm:$0xff] }
0x1736   :  { %5198 = vmatprep.mubr.msk.f32.mxu1 %vm5542_vm1, %v5541_v20 }
0x1800   :  { %v3636_v33 = vpop.f32.mrb[24].mxu0 }
0x1801   :  { %v5175_v48 = vpop.f32.mrb[25].mxu0  ;;  %5183 = vmatprep.mubr.msk.f32.mxu0 %vm348_vm2, %v3636_v33 }
0x1802   :  { %v4706_v48 = vld [vmem:[%s6361_s13 + $0x98] sm:$0xff] }
0x1804   :  { %v3712_v49 = vpop.f32.mrb[48].mxu1 }
0x1805   :  { %v5180_v50 = vpop.f32.mrb[49].mxu1  ;;  %5184 = vmatmul.mubr.msk.f32.vlgmr.msra.gmra.mrb[22].mxu0 %vm348_vm2, %v3712_v49  ;;  %v5357_v49 = vpack.c.bf16 %v4706_v48, %v4705_v45 }
0x1806   :  { %5192 = vmatpush3.xpose.msk.msra.mxu0 %vm348_vm2, %v3880_v43  ;;  %5193 = vmatprep.mubr.msk.f32.mxu0 %vm5542_vm1, %v5541_v20  ;;  %v4703_v43 = vld [vmem:[%s6361_s13 + $0x80] sm:$0xff] }
0x1807   :  { %5201 = vmatprep.subr.mxu0 %v5541_v20  ;;  %v5353_v33 = vpack.c.bf16 %v4704_v44, %v4703_v43  ;;  %v4707_v50 = vld [vmem:[%s6361_s13 + $0xa0] sm:$0xff] }
0x1808   :  { %v3873_v51 = vpop.f32.mrb[50].mxu1 }
0x1809   :  { %v3955_v52 = vmul.f32 0.17677669, %v3873_v51  ;;  %v5190_v53 = vpop.f32.mrb[51].mxu1  ;;  %5194 = vmatmul.mubr.msk.f32.vlgmr.msra.gmra.mrb[26].mxu0 %vm348_vm2, %v3878_v35  ;;  %v4708_v35 = vld [vmem:[%s6361_s13 + $0xa8] sm:$0xff] }
0x180a   :  { %5203 = vmatprep.mubr.msk.f32.mxu0 %vm5542_vm1, %v5541_v20  ;;  %v5361_v51 = vpack.c.bf16 %v4708_v35, %v4707_v50  ;;  %v4710_v53 = vld [vmem:[%s6361_s13 + $0xb8] sm:$0xff] }
0x180b   :  { %v3957_v54 = vsel %vm348_vm2, %v3955_v52, -inf }
0x180c   :  { %3958 = vmax.xlane.f32.xlu0 %v3957_v54 }
0x1899   :  { %v3959_v55 = vpop.xlane.xlu0 %3958 }
0x189a   :  { %v3963_v56 = vsub.f32 %v3955_v52, %v3959_v55  ;;  %v4709_v52 = vld [vmem:[%s6361_s13 + $0xb0] sm:$0xff]  ;;  %v4711_v55 = vld [vmem:[%s6361_s13 + $0xc0] sm:$0xff] }
0x189b   :  { %v5365_v54 = vpack.c.bf16 %v4710_v53, %v4709_v52  ;;  %v4723_v52 = vld [vmem:[%s6363_s15 + $0x1] ss:$0 sm:$0xff] }
0x189c   :  { %v3965_v57 = vmul.f32 1.442695, %v3963_v56  ;;  %v4712_v56 = vld [vmem:[%s6361_s13 + $0xc8] sm:$0xff] }
0x189e   :  { %5470 = vpow2.f32 %v3965_v57  ;;  %v5369_v57 = vpack.c.bf16 %v4712_v56, %v4711_v55  ;;  %v4724_v55 = vld [vmem:[%s6364_s16 + $0x1] ss:$0 sm:$0xff] }
0x18a8   :  { %v5471_v58 = vpop.eup %5470 }
0x18a9   :  { %v3969_v62 = vsel %vm348_vm2, %v5471_v58, 0.0 }
0x18aa   :  { %3970 = vadd.xlane.f32.xlu0 %v3969_v62  ;;  %v4714_v62 = vld [vmem:[%s6361_s13 + $0xd8] sm:$0xff] }
0x18dc   :  { %v3951_v63 = vpop.f32.mrb[26].mxu0 }
0x18dd   :  { %v3956_v3 = vmul.f32 0.17677669, %v3951_v63  ;;  %v5195_v28 = vpop.f32.mrb[27].mxu0 }
0x18de   :  { %v4716_v28 = vld [vmem:[%s6361_s13 + $0xe8] sm:$0xff] }
0x18df   :  { %v3960_v29 = vsel %vm348_vm2, %v3956_v3, -inf }
0x18e0   :  { %3961 = vmax.xlane.f32.xlu1 %v3960_v29 }
0x18f1   :  { %4055 = vrot.lane.b32.xlu1 %v6073_v2, %s6384_s4 }
0x1937   :  { %v3971_v1 = vpop.xlane.xlu0 %3970 }
0x196d   :  { %v3962_v20 = vpop.xlane.xlu1 %3961 }
0x196e   :  { %v3964_v30 = vsub.f32 %v3956_v3, %v3962_v20  ;;  %v4715_v3 = vld [vmem:[%s6361_s13 + $0xe0] sm:$0xff] }
0x196f   :  { %v5377_v29 = vpack.c.bf16 %v4716_v28, %v4715_v3 }
0x1970   :  { %v3967_v12 = vmul.f32 1.442695, %v3964_v30 }
0x1971   :  { %v4056_v5 = vpop.permute.xlu1 %4055 }
0x1972   :  { %5472 = vpow2.f32 %v3967_v12  ;;  %5202 = vmatpush3.msra.mxu0 %v4056_v5 }
0x1973   :  { %5474 = vrcp.f32 %v3971_v1  ;;  %5206 = vmatprep.subr.mxu0 %v4656_v10 }
0x197c   :  { %v5473_v4 = vpop.eup %5472 }
0x197d   :  { %v3972_v6 = vsel %vm348_vm2, %v5473_v4, 0.0  ;;  %v5475_v59 = vpop.eup %5474 }
0x197e   :  { %3973 = vadd.xlane.f32.xlu0 %v3972_v6  ;;  %v3977_v8 = vmul.f32 %v5475_v59, %v5471_v58  ;;  %v4713_v58 = vld [vmem:[%s6361_s13 + $0xd0] sm:$0xff] }
0x197f   :  { %v5373_v63 = vpack.c.bf16 %v4714_v62, %v4713_v58 }
0x1994   :  { %3979 = vrot.lane.b32.xlu0 %v6076_v25, %s6384_s4  ;;  %s5512_s4 = scalar_lea.vmem %s4568_s22, 256 }
0x1995   :  { %p5513_p8 = scmp.ne.s32.totalorder %s4568_s22, %s5512_s4  ;;  %p5518_p10 = scmp.lt.s32.totalorder %s5512_s4, %s5512_s4 }
0x1997   :  { %p5519_p11 = por %p5518_p10, %p5517_p9 }
0x1999   :  { %p5520_p12 = pnand %p5519_p11, %p5513_p8 }
0x1a0b   :  { %v3974_v7 = vpop.xlane.xlu0 %3973 }
0x1a0c   :  { %5476 = vrcp.f32 %v3974_v7  ;;  %v4693_v7 = vld [vmem:[%s6357_s9 + $0x1] ss:$0 sm:$0xff] }
0x1a0f   :  { %v3980_v2 = vpop.permute.xlu0 %3979 }
0x1a10   :  { %5197 = vmatpush3.msra.mxu1 %v3980_v2 }
0x1a11   :  { %5199 = vmatmul.mubr.msk.f32.vlgmr.msra.gmra.mrb[52].mxu1 %vm348_vm2, %v3977_v8  ;;  %5346 = vmatprep.subr.bf16.mxu1 %v5345_v40 }
0x1a12   :  { %5348 = vmatpush3.bf16.msra.mxu1 %v5345_v40 }
0x1a13   :  { %5350 = vmatprep.subr.bf16.mxu1 %v5349_v32 }
0x1a16   :  { %v5477_v9 = vpop.eup %5476  ;;  %5352 = vmatpush3.bf16.msra.mxu1 %v5349_v32 }
0x1a17   :  { %v3978_v61 = vmul.f32 %v5477_v9, %v5473_v4  ;;  %v4694_v9 = vld [vmem:[%s6358_s10 + $0x1] ss:$0 sm:$0xff] }
0x1a19   :  { %5204 = vmatmul.mubr.msk.f32.vlgmr.msra.gmra.mrb[28].mxu0 %vm348_vm2, %v3978_v61 }
0x1a1a   :  { %5207 = vmatpush3.msra.mxu0 %v4656_v10 }
0x1a1b   :  { %5354 = vmatprep.subr.bf16.mxu0 %v5353_v33 }
0x1ae4   :  { %v4051_v25 = vpop.f32.mrb[52].mxu1 }
0x1ae5   :  { %v5200_v60 = vpop.f32.mrb[53].mxu1  ;;  %5208 = vmatprep.mubr.msk.f32.mxu0 %vm348_vm2, %v4051_v25 }
0x1aec   :  { %v4127_v11 = vpop.f32.mrb[28].mxu0 }
0x1aed   :  { %v5205_v13 = vpop.f32.mrb[29].mxu0  ;;  %5209 = vmatmul.mubr.msk.f32.vlgmr.msra.gmra.mrb[22].mxu0 %vm348_vm2, %v4127_v11  ;;  %v4717_v11 = vld [vmem:[%s6361_s13 + $0xf0] sm:$0xff] }
0x1aee   :  { %5356 = vmatpush3.bf16.msra.mxu0 %v5353_v33  ;;  %v4718_v13 = vld [vmem:[%s6361_s13 + $0xf8] sm:$0xff] }
0x1aef   :  { %5358 = vmatprep.subr.bf16.mxu0 %v5357_v49 }
0x1af2   :  { %5360 = vmatpush3.bf16.msra.mxu0 %v5357_v49 }
0x1af3   :  { %5362 = vmatprep.subr.bf16.mxu0 %v5361_v51 }
0x1af6   :  { %5364 = vmatpush3.bf16.msra.mxu0 %v5361_v51 }
0x1af7   :  { %5366 = vmatprep.subr.bf16.mxu0 %v5365_v54 }
0x1afa   :  { %5368 = vmatpush3.bf16.msra.mxu0 %v5365_v54 }
0x1afb   :  { %5370 = vmatprep.subr.bf16.mxu0 %v5369_v57 }
0x1afe   :  { %5372 = vmatpush3.bf16.msra.mxu0 %v5369_v57 }
0x1aff   :  { %5374 = vmatprep.subr.bf16.mxu0 %v5373_v63 }
0x1b02   :  { %5376 = vmatpush3.bf16.msra.mxu0 %v5373_v63 }
0x1b03   :  { %5378 = vmatprep.subr.bf16.mxu0 %v5377_v29 }
0x1b06   :  { %5380 = vmatpush3.bf16.msra.mxu0 %v5377_v29 }
0x1bc0   :  { %v5210_v15 = vpop.f32.mrb[22].mxu0 }
0x1bc1   :  { %v4223_v16 = vadd.f32 %v5210_v15, %v4690_v14  ;;  %v4203_v17 = vpop.f32.mrb[23].mxu0  ;;  %v4700_v15 = vld [vmem:[%s6360_s12 + $0x1] ss:$0 sm:$0xff] }
0x1bc2   :  { %v4222_v18 = vadd.f32 %v4690_v14, %v4203_v17  ;;  %v5381_v14 = vpack.c.bf16 %v4718_v13, %v4717_v11  ;;  %v4725_v11 = vld [vmem:[%s6365_s17] ss:$0 sm:$0xff] }
0x1bc3   :  { %v4225_v19 = vadd.f32 %v4223_v16, %v6018_v47 }
0x1bc4   :  { %v4224_v21 = vadd.f32 %v4222_v18, %v6016_v46  ;;  %5382 = vmatprep.subr.bf16.mxu0 %v5381_v14 }
0x1bc5   :  { %v4233_v22 = vsel %vm90_vm0, %v4225_v19, 0.0  ;;  %5384 = vmatpush3.bf16.msra.mxu0 %v5381_v14 }
0x1bc6   :  { %4234 = vadd.xlane.f32.xlu0 %v4233_v22  ;;  %v4230_v23 = vsel %vm90_vm0, %v4224_v21, 0.0 }
0x1bc7   :  { %4231 = vadd.xlane.f32.xlu1 %v4230_v23  ;;  %v4720_v23 = vld [vmem:[%s6362_s14 + $0x1] ss:$0 sm:$0xff] }
0x1c53   :  { %v4235_v24 = vpop.xlane.xlu0 %4234 }
0x1c54   :  { %v4237_v26 = vmul.f32 0.03125, %v4235_v24  ;;  %v4232_v27 = vpop.xlane.xlu1 %4231 }
0x1c55   :  { %v4236_v31 = vmul.f32 0.03125, %v4232_v27 }
0x1c56   :  { %v6225_v34 = vsub.f32 %v4225_v19, %v4237_v26 }
0x1c57   :  { %v6227_v36 = vsub.f32 %v4224_v21, %v4236_v31 }
0x1c58   :  { %v4241_v37 = vmul.f32 %v6225_v34, %v6225_v34 }
0x1c59   :  { %v4240_v46 = vmul.f32 %v6227_v36, %v6227_v36 }
0x1c5a   :  { %v4245_v47 = vsel %vm90_vm0, %v4241_v37, 0.0 }
0x1c5b   :  { %4246 = vadd.xlane.f32.xlu1 %v4245_v47  ;;  %v4242_v0 = vsel %vm90_vm0, %v4240_v46, 0.0 }
0x1c5c   :  { %4243 = vadd.xlane.f32.xlu0 %v4242_v0 }
0x1ce8   :  { %v4247_v20 = vpop.xlane.xlu1 %4246 }
0x1ce9   :  { %v4249_v30 = vmul.f32 0.03125, %v4247_v20  ;;  %v4244_v12 = vpop.xlane.xlu0 %4243 }
0x1cea   :  { %v4248_v5 = vmul.f32 0.03125, %v4244_v12 }
0x1ceb   :  { %v4251_v4 = vadd.f32 1e-05, %v4249_v30 }
0x1cec   :  { %v4250_v6 = vadd.f32 1e-05, %v4248_v5 }
0x1ced   :  { %5478 = vrsqrt.f32 %v4251_v4 }
0x1cee   :  { %5480 = vrsqrt.f32 %v4250_v6 }
0x1cf7   :  { %v5479_v1 = vpop.eup %5478 }
0x1cf8   :  { %v5481_v59 = vpop.eup %5480  ;;  %v4255_v8 = vmul.f32 %v5479_v1, %v6225_v34 }
0x1cf9   :  { %v4254_v2 = vmul.f32 %v5481_v59, %v6227_v36 }
0x1cfa   :  { %v4263_v61 = vmul.f32 %v4693_v7, %v4255_v8 }
0x1cfb   :  { %v4262_v10 = vmul.f32 %v4693_v7, %v4254_v2 }
0x1cfc   :  { %v4271_v60 = vadd.f32 %v4694_v9, %v4263_v61 }
0x1cfd   :  { %v4270_v25 = vadd.f32 %v4694_v9, %v4262_v10 }
0x1cff   :  { %5219 = vmatprep.mubr.msk.f32.mxu1 %vm90_vm0, %v4270_v25 }
0x1d00   :  { %5220 = vmatmul.mubr.msk.f32.vlgmr.msra.gmra.mrb[54].mxu1 %vm90_vm0, %v4271_v60 }
0x1dd3   :  { %v5221_v16 = vpop.f32.mrb[54].mxu1 }
0x1dd4   :  { %v4363_v17 = vadd.f32 %v5221_v16, %v4700_v15  ;;  %v4357_v18 = vpop.f32.mrb[55].mxu1  ;;  %v4726_v16 = vld [vmem:[%s6366_s18] ss:$0 sm:$0xff] }
0x1dd5   :  { %v4358_v19 = vadd.f32 %v4700_v15, %v4357_v18 }
0x1dd6   :  { %v4367_v22 = vmax.f32 %v4363_v17, 0.0 }
0x1dd7   :  { %v4366_v21 = vmax.f32 %v4358_v19, 0.0 }
0x1dd9   :  { %5254 = vmatprep.mubr.f32.mxu0 %v4366_v21 }
0x1dda   :  { %5255 = vmatmul.mubr.f32.vlgmr.msra.gmra.mrb[30].mxu0 %v4367_v22 }
0x1ead   :  { %v5256_v24 = vpop.f32.mrb[30].mxu0 }
0x1eae   :  { %v4465_v26 = vadd.f32 %v5256_v24, %v4720_v23  ;;  %v4459_v27 = vpop.f32.mrb[31].mxu0 }
0x1eaf   :  { %v4460_v31 = vadd.f32 %v4720_v23, %v4459_v27 }
0x1eb0   :  { %v4469_v34 = vadd.f32 %v4465_v26, %v4271_v60 }
0x1eb1   :  { %v4468_v36 = vadd.f32 %v4460_v31, %v4270_v25 }
0x1eb2   :  { %v4477_v37 = vsel %vm90_vm0, %v4469_v34, 0.0 }
0x1eb3   :  { %4478 = vadd.xlane.f32.xlu1 %v4477_v37  ;;  %v4474_v46 = vsel %vm90_vm0, %v4468_v36, 0.0 }
0x1eb4   :  { %4475 = vadd.xlane.f32.xlu0 %v4474_v46 }
0x1f40   :  { %v4479_v47 = vpop.xlane.xlu1 %4478 }
0x1f41   :  { %v4481_v0 = vmul.f32 0.03125, %v4479_v47  ;;  %v4476_v38 = vpop.xlane.xlu0 %4475 }
0x1f42   :  { %v4480_v39 = vmul.f32 0.03125, %v4476_v38 }
0x1f43   :  { %v4483_v40 = vsub.f32 %v4469_v34, %v4481_v0 }
0x1f44   :  { %v4482_v41 = vsub.f32 %v4468_v36, %v4480_v39 }
0x1f45   :  { %v4485_v42 = vmul.f32 %v4483_v40, %v4483_v40 }
0x1f46   :  { %v4484_v32 = vmul.f32 %v4482_v41, %v4482_v41 }
0x1f47   :  { %v4489_v43 = vsel %vm90_vm0, %v4485_v42, 0.0 }
0x1f48   :  { %4490 = vadd.xlane.f32.xlu1 %v4489_v43  ;;  %v4486_v44 = vsel %vm90_vm0, %v4484_v32, 0.0 }
0x1f49   :  { %4487 = vadd.xlane.f32.xlu0 %v4486_v44 }
0x1fd5   :  { %v4491_v45 = vpop.xlane.xlu1 %4490 }
0x1fd6   :  { %v4493_v33 = vmul.f32 0.03125, %v4491_v45  ;;  %v4488_v48 = vpop.xlane.xlu0 %4487 }
0x1fd7   :  { %v4492_v49 = vmul.f32 0.03125, %v4488_v48 }
0x1fd8   :  { %v4495_v50 = vadd.f32 1e-05, %v4493_v33 }
0x1fd9   :  { %v4494_v35 = vadd.f32 1e-05, %v4492_v49 }
0x1fda   :  { %5482 = vrsqrt.f32 %v4495_v50 }
0x1fdb   :  { %5484 = vrsqrt.f32 %v4494_v35 }
0x1fe4   :  { %v5483_v51 = vpop.eup %5482 }
0x1fe5   :  { %v5485_v53 = vpop.eup %5484  ;;  %v4499_v54 = vmul.f32 %v5483_v51, %v4483_v40 }
0x1fe6   :  { %v4498_v56 = vmul.f32 %v5485_v53, %v4482_v41 }
0x1fe7   :  { %v4507_v57 = vmul.f32 %v4723_v52, %v4499_v54 }
0x1fe8   :  { %v4506_v58 = vmul.f32 %v4723_v52, %v4498_v56 }
0x1fe9   :  { %v4515_v62 = vadd.f32 %v4724_v55, %v4507_v57 }
0x1fea   :  { %v4514_v63 = vadd.f32 %v4724_v55, %v4506_v58 }
0x1feb   :  { %v4521_v3 = vsel %vm90_vm0, %v4515_v62, 0.0 }
0x1fec   :  { %4522 = vadd.xlane.f32.xlu1 %v4521_v3  ;;  %v4518_v28 = vsel %vm90_vm0, %v4514_v63, 0.0 }
0x1fed   :  { %4519 = vadd.xlane.f32.xlu0 %v4518_v28 }
0x2079   :  { %v4523_v29 = vpop.xlane.xlu1 %4522 }
0x207a   :  { %v4525_v20 = vmul.f32 0.03125, %v4523_v29  ;;  %v4520_v30 = vpop.xlane.xlu0 %4519 }
0x207b   :  { %v4524_v12 = vmul.f32 0.03125, %v4520_v30 }
0x207c   :  { %v4527_v5 = vsub.f32 %v4515_v62, %v4525_v20 }
0x207d   :  { %v4526_v4 = vsub.f32 %v4514_v63, %v4524_v12 }
0x207e   :  { %v4529_v6 = vmul.f32 %v4527_v5, %v4527_v5 }
0x207f   :  { %v4528_v1 = vmul.f32 %v4526_v4, %v4526_v4 }
0x2080   :  { %v4533_v7 = vsel %vm90_vm0, %v4529_v6, 0.0 }
0x2081   :  { %4534 = vadd.xlane.f32.xlu1 %v4533_v7  ;;  %v4530_v59 = vsel %vm90_vm0, %v4528_v1, 0.0 }
0x2082   :  { %4531 = vadd.xlane.f32.xlu0 %v4530_v59 }
0x210e   :  { %v4535_v8 = vpop.xlane.xlu1 %4534 }
0x210f   :  { %v4537_v2 = vmul.f32 0.03125, %v4535_v8  ;;  %v4532_v9 = vpop.xlane.xlu0 %4531 }
0x2110   :  { %v4536_v61 = vmul.f32 0.03125, %v4532_v9 }
0x2111   :  { %v4539_v10 = vadd.f32 1e-05, %v4537_v2 }
0x2112   :  { %v4538_v25 = vadd.f32 1e-05, %v4536_v61 }
0x2113   :  { %5486 = vrsqrt.f32 %v4539_v10 }
0x2114   :  { %5488 = vrsqrt.f32 %v4538_v25 }
0x211d   :  { %v5487_v60 = vpop.eup %5486 }
0x211e   :  { %v5489_v13 = vpop.eup %5488  ;;  %v4543_v14 = vmul.f32 %v5487_v60, %v4527_v5 }
0x211f   :  { %v4542_v15 = vmul.f32 %v5489_v13, %v4526_v4 }
0x2120   :  { %v4551_v17 = vmul.f32 %v4725_v11, %v4543_v14 }
0x2121   :  { %v4550_v18 = vmul.f32 %v4725_v11, %v4542_v15 }
0x2122   :  { %v4559_v19 = vadd.f32 %v4726_v16, %v4551_v17 }
0x2123   :  { %v4558_v21 = vadd.f32 %v4726_v16, %v4550_v18 }
0x2124   :  { %4561 = vst.msk [vmem:[#allocation5 + $0x8] sm:$0xff] %vm90_vm0, %v4559_v19 }
0x2125   :  { %4560 = vst.msk [vmem:[#allocation5] sm:$0xff] %vm90_vm0, %v4558_v21 }
0x2126   :  { %5523 = shalt.err (!%p5520_p12)
}
0x2127   :  { %s5524_s6 = scalar_lea.hbm %s6367_s19, 256 }
0x2128   :  { %p5525_p13 = scmp.ne.s32.totalorder %s6367_s19, %s5524_s6  ;;  %p5528_p0 = scmp.lt.u32.totalorder %s5524_s6, %s6367_s19 }
0x212a   :  { %p5530_p1 = pnand %p5528_p0, %p5525_p13 }
0x212c   :  { %5533 = shalt.err (!%p5530_p1)
}
0x212d   :  { %s6385_s11 = smov 8   ;;  %s6386_s24 = smov 128  }
0x212e   :  { %4573 = dma.vmem_to_hbm [thread:$0]  %s4568_s22, 256, %s6367_s19, [#allocation4], %s6386_s24, %s6386_s24, %s6385_s11  }
0x212f   :  { %5536 = dma.done.wait [#allocation4], 256  }
0x2130   :  { %5537 = vsyncadd [#allocation4], 4294967040 }
0x2131   :  { %4577 = vsyncpa [#allocation3], 1 }
0x2132   :  { %4578 = vsyncpa [#allocation4], 1 }

</bundles_post_ra>
